<compile_context>
chip_gen: v7x
topology: tpu7x:2x2x1
jax: 0.10.0
libtpu: 0.0.40
codegen_flags: <defaults>
</compile_context>

<pallas_src>
import jax
import jax.numpy as jnp
from jax import lax
from jax.experimental import pallas as pl
from jax.experimental.pallas import tpu as pltpu

F32 = jnp.float32
BF16 = jnp.bfloat16

# ------------------------- static shape bookkeeping -------------------------
FIB_K = (2, 3, 5, 8, 13)            # fib(3..7) digger kernel sizes
IN_H, IN_W = 9, 114                 # x.view(1,1,9,-1) forced by Linear(6658,666)
IN_LEN = IN_H * IN_W                # 1026 = K of the folded GEMM
EXPL_H, EXPL_W = 18, 108            # x_exploded = (1,1,18,108)
GOLD_LEN = sum((EXPL_H - k + 1) * (EXPL_W - k + 1) for k in FIB_K)   # 6658
K_PAD = 1152                        # 1026 -> 9*128 (clean lanes/sublanes)
FILT_N, FILT_NPAD = 666, 768        # filter out features, padded to 6*128
FILT_TILE = 384                     # N tile -> grid leading axis 768/384 = 2 (even v7x split)
HID = 40                            # LSTM hidden size per direction
H2 = 2 * HID                        # 80 = bidirectional hidden
H2_PAD = 128
GATES = 8 * HID                     # 320 = 4 gates x 2 directions
GATES_PAD = 384


# ------------------------------ Pallas kernels ------------------------------

def _filter_kernel(x_ref, w_ref, b_ref, o_ref):
    # (1, K_PAD) bf16 @ (K_PAD, FILT_TILE) bf16 -> f32 MXU accumulate, + f32 bias.
    o_ref[...] = (
        jnp.dot(x_ref[...], w_ref[...], preferred_element_type=F32) + b_ref[...]
    )


def _bilstm_cell(gates):
    # gates: (1, >=320) f32, columns ordered [i_f,i_b | f_f,f_b | g_f,g_b | o_f,o_b].
    # Zero initial state => c = i*g (forget gate drops), h = o*tanh(c).
    i = jax.nn.sigmoid(gates[:, 0:H2])
    g = jnp.tanh(gates[:, 2 * H2:3 * H2])
    o = jax.nn.sigmoid(gates[:, 3 * H2:4 * H2])
    return o * jnp.tanh(i * g)                 # (1, 80) == concat(h_fwd, h_bwd)


def _predictor_kernel(filt_ref, val_ref, w1_ref, b1_ref, w2_ref, b2_ref,
                      wfc_ref, bfc_ref, wc_ref, wv_ref, bm_ref,
                      code_ref, ans_ref):
    zpad = jnp.zeros((1, H2_PAD - H2), F32)

    x = filt_ref[...].astype(BF16)                                        # (1, 768)
    g1 = jnp.dot(x, w1_ref[...], preferred_element_type=F32) + b1_ref[...]
    h1 = jnp.concatenate([_bilstm_cell(g1), zpad], axis=-1)               # (1, 128)
    g2 = (jnp.dot(h1.astype(BF16), w2_ref[...], preferred_element_type=F32)
          + b2_ref[...])
    h2 = jnp.concatenate([_bilstm_cell(g2), zpad], axis=-1)               # (1, 128)

    raw = (jnp.dot(h2.astype(BF16), wfc_ref[...], preferred_element_type=F32)
           + bfc_ref[...])
    raw = raw[:, :20]                                                     # (1, 20)
    m = jnp.max(raw, axis=-1, keepdims=True)
    s = raw - m
    code = s - jnp.log(jnp.sum(jnp.exp(s), axis=-1, keepdims=True))       # log_softmax
    code_ref[...] = code
    ans_ref[...] = (jnp.sum(jnp.exp(code) * wc_ref[...], axis=-1, keepdims=True)
                    + val_ref[...] * wv_ref[...] + bm_ref[...])


# ------------------------------- call wrappers ------------------------------

def pallas_filters(x_in, fw, fb):
    # x_in: (1, K_PAD) bf16; fw: (5, K_PAD, FILT_NPAD) bf16; fb: (5, 1, FILT_NPAD) f32
    return pl.pallas_call(
        _filter_kernel,
        out_shape=jax.ShapeDtypeStruct((5, 1, FILT_NPAD), F32),
        grid=(FILT_NPAD // FILT_TILE, 5),        # leading axis 2 -> even megacore split
        in_specs=[
            pl.BlockSpec((1, K_PAD), lambda j, m: (0, 0)),
            pl.BlockSpec((None, K_PAD, FILT_TILE), lambda j, m: (m, 0, j)),
            pl.BlockSpec((None, 1, FILT_TILE), lambda j, m: (m, 0, j)),
        ],
        out_specs=pl.BlockSpec((None, 1, FILT_TILE), lambda j, m: (m, 0, j)),
        compiler_params=pltpu.CompilerParams(
            dimension_semantics=("parallel", "parallel"),
        ),
    )(x_in, fw, fb)


def pallas_predictors(filt, val2d, sp):
    def spec3(arr):
        return pl.BlockSpec((None,) + arr.shape[1:], lambda m: (m, 0, 0))

    in_specs = [
        pl.BlockSpec((None, 1, FILT_NPAD), lambda m: (m, 0, 0)),   # filter outputs
        pl.BlockSpec((1, 1), lambda m: (0, 0)),                    # val (shared)
        spec3(sp["w1"]), spec3(sp["b1"]),
        spec3(sp["w2"]), spec3(sp["b2"]),
        spec3(sp["wfc"]), spec3(sp["bfc"]),
        spec3(sp["wc"]), spec3(sp["wv"]), spec3(sp["bm"]),
    ]
    return pl.pallas_call(
        _predictor_kernel,
        out_shape=(jax.ShapeDtypeStruct((5, 1, 20), F32),
                   jax.ShapeDtypeStruct((5, 1, 1), F32)),
        grid=(5,),
        in_specs=in_specs,
        out_specs=(pl.BlockSpec((None, 1, 20), lambda m: (m, 0, 0)),
                   pl.BlockSpec((None, 1, 1), lambda m: (m, 0, 0))),
        compiler_params=pltpu.CompilerParams(dimension_semantics=("parallel",)),
    )(filt, val2d, sp["w1"], sp["b1"], sp["w2"], sp["b2"],
      sp["wfc"], sp["bfc"], sp["wc"], sp["wv"], sp["bm"])


# --------------------------------- forward ----------------------------------

def topnet2_forward(prep, x, val):
    # Whole linear front end is pre-folded: filt_m = vec(x) @ A_m + c_m.
    xf = x.reshape(1, IN_LEN).astype(F32)
    x_in = jnp.zeros((1, K_PAD), F32).at[:, :IN_LEN].set(xf).astype(BF16)

    filt = pallas_filters(x_in, prep["filter_w"], prep["filter_b"])      # (5, 1, 768) f32

    val2d = val.reshape(1, 1).astype(F32)
    codes, ans = pallas_predictors(filt, val2d, prep["predictor"])       # (5,1,20),(5,1,1)

    # updn: log_softmax(exp(c_i) - exp(c_{i-1})), i = 1..4 -- 80 elements, plain jnp.
    codes2 = codes.reshape(5, 20)
    diff = jnp.exp(codes2[1:5]) - jnp.exp(codes2[0:4])
    updn_rest = jax.nn.log_softmax(diff, axis=-1)                        # (4, 20)

    code_list = [codes[m].reshape(1, 1, 20) for m in range(5)]
    ans_list = [ans[m].reshape(1, 1) for m in range(5)]
    updn = [code_list[0]] + [updn_rest[i].reshape(1, 1, 20) for i in range(4)]
    return code_list, ans_list, updn


# ------------------------------ param handling -------------------------------

def init_params(key):
    """Parameters in PyTorch layout (Linear: (out,in), Conv: (oc,ic,kh,kw), LSTM rows i,f,g,o)."""
    keys = iter(jax.random.split(key, 256))

    def u(shape, fan_in):
        bound = 1.0 / (float(fan_in) ** 0.5)
        return jax.random.uniform(next(keys), shape, F32, -bound, bound)

    def lstm_dir(in_sz, hid):
        return {
            "w_ih": u((4 * hid, in_sz), hid),
            "w_hh": u((4 * hid, hid), hid),   # unused at runtime: h0 == 0
            "b_ih": u((4 * hid,), hid),
            "b_hh": u((4 * hid,), hid),
        }

    def subnet():
        return {
            "lstm": [
                {"fwd": lstm_dir(666, HID), "bwd": lstm_dir(666, HID)},
                {"fwd": lstm_dir(H2, HID), "bwd": lstm_dir(H2, HID)},
            ],
            "fc_w": u((20, H2), H2), "fc_b": u((20,), H2),
            "mix_w": u((1, 21), 21), "mix_b": u((1,), 21),
        }

    return {
        "explode_w": u((6, 1, 7, 7), 49),
        "explode_b": u((6,), 49),
        "diggers": [(u((1, 1, k, k), k * k), u((1,), k * k)) for k in FIB_K],
        "filter": [{"w": u((FILT_N, GOLD_LEN), GOLD_LEN),
                    "b": u((FILT_N,), GOLD_LEN)} for _ in range(5)],
        "predictor": [subnet() for _ in range(5)],
    }


def prepare_params(params):
    """One-time (outside the forward) fold / transpose / pad / gate-reorder of all weights."""
    explode_w = params["explode_w"].astype(F32)                 # (6,1,7,7)
    explode_b = params["explode_b"].astype(F32)                 # (6,)
    dig_ws = [w.astype(F32) for (w, _) in params["diggers"]]    # (1,1,k,k)
    dig_bs = [b.astype(F32) for (_, b) in params["diggers"]]    # (1,)

    def frontend(xb):
        """Pure-jnp reference of explode -> view(1,1,18,-1) -> diggers -> cat. (B,1026)->(B,6658)."""
        B = xb.shape[0]
        x4 = xb.reshape(B, 1, IN_H, IN_W)
        e = lax.conv_general_dilated(x4, explode_w, (1, 1), "VALID",
                                     dimension_numbers=("NCHW", "OIHW", "NCHW"))
        e = e + explode_b.reshape(1, 6, 1, 1)                   # (B,6,3,108)
        xe = e.reshape(B, 1, EXPL_H, EXPL_W)                    # row-major == torch .view
        outs = []
        for w, b in zip(dig_ws, dig_bs):
            o = lax.conv_general_dilated(xe, w, (1, 1), "VALID",
                                         dimension_numbers=("NCHW", "OIHW", "NCHW"))
            outs.append(o.reshape(B, -1) + b.reshape(1, 1))
        return jnp.concatenate(outs, axis=1)                    # (B, 6658)

    # Affine decomposition of the front end: gold(x) = x @ DE + g0 (exact: no activations).
    g0 = frontend(jnp.zeros((1, IN_LEN), F32))[0]               # (6658,)
    assert int(g0.shape[0]) == GOLD_LEN
    DE = frontend(jnp.eye(IN_LEN, dtype=F32)) - g0[None, :]     # (1026, 6658)

    # Fold each filter Linear(6658,666): A_m = DE @ W_m^T, c_m = g0 @ W_m^T + b_m.
    filt_w, filt_b = [], []
    for p in params["filter"]:
        Wm, bm = p["w"].astype(F32), p["b"].astype(F32)
        A = DE @ Wm.T                                           # (1026, 666)
        c = g0 @ Wm.T + bm                                      # (666,)
        filt_w.append(jnp.zeros((K_PAD, FILT_NPAD), F32).at[:IN_LEN, :FILT_N].set(A))
        filt_b.append(jnp.zeros((1, FILT_NPAD), F32).at[0, :FILT_N].set(c))
    filter_w = jnp.stack(filt_w).astype(BF16)                   # (5, 1152, 768) bf16 stream
    filter_b = jnp.stack(filt_b)                                # (5, 1, 768) f32

    def gate_interleave(a_fwd, a_bwd):
        # rows [i,f,g,o] per direction -> [i_f,i_b,f_f,f_b,g_f,g_b,o_f,o_b]
        blocks = []
        for gi in range(4):
            blocks.append(a_fwd[gi * HID:(gi + 1) * HID])
            blocks.append(a_bwd[gi * HID:(gi + 1) * HID])
        return jnp.concatenate(blocks, axis=0)

    def lstm_layer(layer_p, in_pad):
        f, b = layer_p["fwd"], layer_p["bwd"]
        w = gate_interleave(f["w_ih"], b["w_ih"]).T                          # (in, 320)
        bias = gate_interleave(f["b_ih"] + f["b_hh"], b["b_ih"] + b["b_hh"]) # (320,)
        in_dim = w.shape[0]
        w_pad = jnp.zeros((in_pad, GATES_PAD), F32).at[:in_dim, :GATES].set(w)
        b_pad = jnp.zeros((1, GATES_PAD), F32).at[0, :GATES].set(bias)
        return w_pad, b_pad

    def subnet_prep(sp):
        w1, b1 = lstm_layer(sp["lstm"][0], FILT_NPAD)           # (768, 384), (1, 384)
        w2, b2 = lstm_layer(sp["lstm"][1], H2_PAD)              # (128, 384), (1, 384)
        wfc = jnp.zeros((H2_PAD, 128), F32).at[:H2, :20].set(sp["fc_w"].T)
        bfc = jnp.zeros((1, 128), F32).at[0, :20].set(sp["fc_b"])
        wc = sp["mix_w"][:, :20].astype(F32)                    # (1, 20)
        wv = sp["mix_w"][:, 20:21].astype(F32)                  # (1, 1)
        bm = sp["mix_b"].reshape(1, 1).astype(F32)
        return w1, b1, w2, b2, wfc, bfc, wc, wv, bm

    preds = [subnet_prep(sp) for sp in params["predictor"]]
    stack = lambda i: jnp.stack([p[i] for p in preds])
    predictor = {
        "w1": stack(0).astype(BF16), "b1": stack(1),
        "w2": stack(2).astype(BF16), "b2": stack(3),
        "wfc": stack(4).astype(BF16), "bfc": stack(5),
        "wc": stack(6), "wv": stack(7), "bm": stack(8),
    }
    return {"filter_w": filter_w, "filter_b": filter_b, "predictor": predictor}


# ----------------------------------- main ------------------------------------

if __name__ == "__main__":
    key = jax.random.PRNGKey(0)
    k_params, k_x, k_val = jax.random.split(key, 3)

    params = init_params(k_params)
    prep = prepare_params(params)    # one-time weight fold / layout prep (outside forward)

    # Linear(6658, 666) worked back through the convs forces x.view(1,1,9,-1) == (1,1,9,114)
    # (1026 elements) and val to be a scalar.
    x = jax.random.normal(k_x, (1, 1, 9, 114), F32)
    val = jax.random.normal(k_val, (1,), F32)

    fwd = jax.jit(topnet2_forward)
    code_list, ans_list, updn = fwd(prep, x, val)
    jax.block_until_ready((code_list, ans_list, updn))

    assert len(code_list) == 5 and len(ans_list) == 5 and len(updn) == 5
    assert code_list[0].shape == (1, 1, 20)
    assert ans_list[0].shape == (1, 1)
    assert updn[4].shape == (1, 1, 20)
    assert all(bool(jnp.all(jnp.isfinite(a))) for a in code_list + ans_list + updn)
    print("KERNEL_OK")
</pallas_src>

<mosaic_0001>
module attributes {stable_mosaic.version = 11 : i64} {
  func.func @_filter_kernel(%arg0: i32, %arg1: i32, %arg2: memref<1x1152xbf16, #tpu.memory_space<vmem>>, %arg3: memref<1x1152x384xbf16, #tpu.memory_space<vmem>>, %arg4: memref<1x1x384xf32, #tpu.memory_space<vmem>>, %arg5: memref<1x1x384xf32, #tpu.memory_space<vmem>>) attributes {dimension_semantics = [#tpu.dimension_semantics<parallel>, #tpu.dimension_semantics<parallel>], iteration_bounds = array<i64: 2, 5>, scalar_prefetch = 0 : i64, scratch_operands = 0 : i64, tpu.core_type = #tpu.core_type<tc>, window_params = [{pipeline_mode = #tpu.pipeline_mode<synchronous>, transform_indices = @transform_0, window_bounds = array<i64: 1, 1152>}, {transform_indices = @transform_1, window_bounds = array<i64: 1, 1152, 384>}, {transform_indices = @transform_2, window_bounds = array<i64: 1, 1, 384>}, {transform_indices = @transform_3, window_bounds = array<i64: 1, 1, 384>}]} {
    %c0 = arith.constant 0 : index
    %c0_0 = arith.constant 0 : index
    %0 = vector.load %arg2[%c0, %c0_0] : memref<1x1152xbf16, #tpu.memory_space<vmem>>, vector<1x1152xbf16>
    %c0_1 = arith.constant 0 : index
    %c0_2 = arith.constant 0 : index
    %c0_3 = arith.constant 0 : index
    %1 = vector.load %arg3[%c0_1, %c0_2, %c0_3] : memref<1x1152x384xbf16, #tpu.memory_space<vmem>>, vector<1x1152x384xbf16>
    %2 = vector.shape_cast %1 : vector<1x1152x384xbf16> to vector<1152x384xbf16>
    %cst = arith.constant dense<0.000000e+00> : vector<1x384xf32>
    %3 = tpu.matmul %0, %2, %cst {dimension_numbers = #tpu.dot_dimension_numbers<[1], [0], [0], [1], [0, 0, 1, 1], [], []>} : vector<1x1152xbf16>, vector<1152x384xbf16>, vector<1x384xf32> -> vector<1x384xf32>
    %c0_4 = arith.constant 0 : index
    %c0_5 = arith.constant 0 : index
    %c0_6 = arith.constant 0 : index
    %4 = vector.load %arg4[%c0_4, %c0_5, %c0_6] : memref<1x1x384xf32, #tpu.memory_space<vmem>>, vector<1x1x384xf32>
    %5 = vector.shape_cast %4 : vector<1x1x384xf32> to vector<1x384xf32>
    %6 = arith.addf %3, %5 : vector<1x384xf32>
    %c0_7 = arith.constant 0 : index
    %c0_8 = arith.constant 0 : index
    %c0_9 = arith.constant 0 : index
    %7 = vector.load %arg5[%c0_7, %c0_8, %c0_9] : memref<1x1x384xf32, #tpu.memory_space<vmem>>, vector<1x1x384xf32>
    %8 = vector.shape_cast %7 : vector<1x1x384xf32> to vector<1x384xf32>
    %9 = vector.shape_cast %6 : vector<1x384xf32> to vector<1x1x384xf32>
    tpu.vector_store %arg5[%c0_7, %c0_8, %c0_9], %9 {strides = array<i32>} : memref<1x1x384xf32, #tpu.memory_space<vmem>>, vector<1x1x384xf32>,
    return
  }
  func.func @transform_0(%arg0: i32, %arg1: i32) -> (i32, i32) {
    %c0_i32 = arith.constant 0 : i32
    %c0_i32_0 = arith.constant 0 : i32
    %c0_i32_1 = arith.constant 0 : i32
    return %c0_i32, %c0_i32_0 : i32, i32
  }
  func.func @transform_1(%arg0: i32, %arg1: i32) -> (i32, i32, i32) {
    %c0_i32 = arith.constant 0 : i32
    %c0_i32_0 = arith.constant 0 : i32
    return %arg1, %c0_i32, %arg0 : i32, i32, i32
  }
  func.func @transform_2(%arg0: i32, %arg1: i32) -> (i32, i32, i32) {
    %c0_i32 = arith.constant 0 : i32
    %c0_i32_0 = arith.constant 0 : i32
    return %arg1, %c0_i32, %arg0 : i32, i32, i32
  }
  func.func @transform_3(%arg0: i32, %arg1: i32) -> (i32, i32, i32) {
    %c0_i32 = arith.constant 0 : i32
    %c0_i32_0 = arith.constant 0 : i32
    return %arg1, %c0_i32, %arg0 : i32, i32, i32
  }
}

module attributes {stable_mosaic.version = 11 : i64} {
  func.func @_predictor_kernel(%arg0: i32, %arg1: memref<1x1x768xf32, #tpu.memory_space<vmem>>, %arg2: memref<1x1xf32, #tpu.memory_space<vmem>>, %arg3: memref<1x768x384xbf16, #tpu.memory_space<vmem>>, %arg4: memref<1x1x384xf32, #tpu.memory_space<vmem>>, %arg5: memref<1x128x384xbf16, #tpu.memory_space<vmem>>, %arg6: memref<1x1x384xf32, #tpu.memory_space<vmem>>, %arg7: memref<1x128x128xbf16, #tpu.memory_space<vmem>>, %arg8: memref<1x1x128xf32, #tpu.memory_space<vmem>>, %arg9: memref<1x1x20xf32, #tpu.memory_space<vmem>>, %arg10: memref<1x1x1xf32, #tpu.memory_space<vmem>>, %arg11: memref<1x1x1xf32, #tpu.memory_space<vmem>>, %arg12: memref<1x1x20xf32, #tpu.memory_space<vmem>>, %arg13: memref<1x1x1xf32, #tpu.memory_space<vmem>>) attributes {dimension_semantics = [#tpu.dimension_semantics<parallel>], iteration_bounds = array<i64: 5>, scalar_prefetch = 0 : i64, scratch_operands = 0 : i64, tpu.core_type = #tpu.core_type<tc>, window_params = [{transform_indices = @transform_0, window_bounds = array<i64: 1, 1, 768>}, {pipeline_mode = #tpu.pipeline_mode<synchronous>, transform_indices = @transform_1, window_bounds = array<i64: 1, 1>}, {transform_indices = @transform_2, window_bounds = array<i64: 1, 768, 384>}, {transform_indices = @transform_3, window_bounds = array<i64: 1, 1, 384>}, {transform_indices = @transform_4, window_bounds = array<i64: 1, 128, 384>}, {transform_indices = @transform_5, window_bounds = array<i64: 1, 1, 384>}, {transform_indices = @transform_6, window_bounds = array<i64: 1, 128, 128>}, {transform_indices = @transform_7, window_bounds = array<i64: 1, 1, 128>}, {transform_indices = @transform_8, window_bounds = array<i64: 1, 1, 20>}, {transform_indices = @transform_9, window_bounds = array<i64: 1, 1, 1>}, {transform_indices = @transform_10, window_bounds = array<i64: 1, 1, 1>}, {transform_indices = @transform_11, window_bounds = array<i64: 1, 1, 20>}, {transform_indices = @transform_12, window_bounds = array<i64: 1, 1, 1>}]} {
    %cst = arith.constant 0.000000e+00 : f32
    %0 = vector.broadcast %cst : f32 to vector<1x48xf32>
    %c0 = arith.constant 0 : index
    %c0_0 = arith.constant 0 : index
    %c0_1 = arith.constant 0 : index
    %1 = vector.load %arg1[%c0, %c0_0, %c0_1] : memref<1x1x768xf32, #tpu.memory_space<vmem>>, vector<1x1x768xf32>
    %2 = vector.shape_cast %1 : vector<1x1x768xf32> to vector<1x768xf32>
    %3 = arith.truncf %2 : vector<1x768xf32> to vector<1x768xbf16>
    %c0_2 = arith.constant 0 : index
    %c0_3 = arith.constant 0 : index
    %c0_4 = arith.constant 0 : index
    %4 = vector.load %arg3[%c0_2, %c0_3, %c0_4] : memref<1x768x384xbf16, #tpu.memory_space<vmem>>, vector<1x768x384xbf16>
    %5 = vector.shape_cast %4 : vector<1x768x384xbf16> to vector<768x384xbf16>
    %cst_5 = arith.constant dense<0.000000e+00> : vector<1x384xf32>
    %6 = tpu.matmul %3, %5, %cst_5 {dimension_numbers = #tpu.dot_dimension_numbers<[1], [0], [0], [1], [0, 0, 1, 1], [], []>} : vector<1x768xbf16>, vector<768x384xbf16>, vector<1x384xf32> -> vector<1x384xf32>
    %c0_6 = arith.constant 0 : index
    %c0_7 = arith.constant 0 : index
    %c0_8 = arith.constant 0 : index
    %7 = vector.load %arg4[%c0_6, %c0_7, %c0_8] : memref<1x1x384xf32, #tpu.memory_space<vmem>>, vector<1x1x384xf32>
    %8 = vector.shape_cast %7 : vector<1x1x384xf32> to vector<1x384xf32>
    %9 = arith.addf %6, %8 : vector<1x384xf32>
    %10 = vector.extract_strided_slice %9 {offsets = [0, 0], sizes = [1, 80], strides = [1, 1]} : vector<1x384xf32> to vector<1x80xf32>
    %11 = arith.negf %10 : vector<1x80xf32>
    %12 = math.exp %11 : vector<1x80xf32>
    %cst_9 = arith.constant 1.000000e+00 : f32
    %13 = vector.broadcast %cst_9 : f32 to vector<1x80xf32>
    %14 = arith.addf %13, %12 : vector<1x80xf32>
    %15 = arith.divf %13, %14 : vector<1x80xf32>
    %16 = vector.extract_strided_slice %9 {offsets = [0, 160], sizes = [1, 80], strides = [1, 1]} : vector<1x384xf32> to vector<1x80xf32>
    %17 = math.tanh %16 : vector<1x80xf32>
    %18 = vector.extract_strided_slice %9 {offsets = [0, 240], sizes = [1, 80], strides = [1, 1]} : vector<1x384xf32> to vector<1x80xf32>
    %19 = arith.negf %18 : vector<1x80xf32>
    %20 = math.exp %19 : vector<1x80xf32>
    %cst_10 = arith.constant 1.000000e+00 : f32
    %21 = vector.broadcast %cst_10 : f32 to vector<1x80xf32>
    %22 = arith.addf %21, %20 : vector<1x80xf32>
    %23 = arith.divf %21, %22 : vector<1x80xf32>
    %24 = arith.mulf %15, %17 : vector<1x80xf32>
    %25 = math.tanh %24 : vector<1x80xf32>
    %26 = arith.mulf %23, %25 : vector<1x80xf32>
    %27 = tpu.concatenate %26, %0 in 1 : vector<1x80xf32>, vector<1x48xf32> -> vector<1x128xf32>
    %28 = arith.truncf %27 : vector<1x128xf32> to vector<1x128xbf16>
    %c0_11 = arith.constant 0 : index
    %c0_12 = arith.constant 0 : index
    %c0_13 = arith.constant 0 : index
    %29 = vector.load %arg5[%c0_11, %c0_12, %c0_13] : memref<1x128x384xbf16, #tpu.memory_space<vmem>>, vector<1x128x384xbf16>
    %30 = vector.shape_cast %29 : vector<1x128x384xbf16> to vector<128x384xbf16>
    %cst_14 = arith.constant dense<0.000000e+00> : vector<1x384xf32>
    %31 = tpu.matmul %28, %30, %cst_14 {dimension_numbers = #tpu.dot_dimension_numbers<[1], [0], [0], [1], [0, 0, 1, 1], [], []>} : vector<1x128xbf16>, vector<128x384xbf16>, vector<1x384xf32> -> vector<1x384xf32>
    %c0_15 = arith.constant 0 : index
    %c0_16 = arith.constant 0 : index
    %c0_17 = arith.constant 0 : index
    %32 = vector.load %arg6[%c0_15, %c0_16, %c0_17] : memref<1x1x384xf32, #tpu.memory_space<vmem>>, vector<1x1x384xf32>
    %33 = vector.shape_cast %32 : vector<1x1x384xf32> to vector<1x384xf32>
    %34 = arith.addf %31, %33 : vector<1x384xf32>
    %35 = vector.extract_strided_slice %34 {offsets = [0, 0], sizes = [1, 80], strides = [1, 1]} : vector<1x384xf32> to vector<1x80xf32>
    %36 = arith.negf %35 : vector<1x80xf32>
    %37 = math.exp %36 : vector<1x80xf32>
    %cst_18 = arith.constant 1.000000e+00 : f32
    %38 = vector.broadcast %cst_18 : f32 to vector<1x80xf32>
    %39 = arith.addf %38, %37 : vector<1x80xf32>
    %40 = arith.divf %38, %39 : vector<1x80xf32>
    %41 = vector.extract_strided_slice %34 {offsets = [0, 160], sizes = [1, 80], strides = [1, 1]} : vector<1x384xf32> to vector<1x80xf32>
    %42 = math.tanh %41 : vector<1x80xf32>
    %43 = vector.extract_strided_slice %34 {offsets = [0, 240], sizes = [1, 80], strides = [1, 1]} : vector<1x384xf32> to vector<1x80xf32>
    %44 = arith.negf %43 : vector<1x80xf32>
    %45 = math.exp %44 : vector<1x80xf32>
    %cst_19 = arith.constant 1.000000e+00 : f32
    %46 = vector.broadcast %cst_19 : f32 to vector<1x80xf32>
    %47 = arith.addf %46, %45 : vector<1x80xf32>
    %48 = arith.divf %46, %47 : vector<1x80xf32>
    %49 = arith.mulf %40, %42 : vector<1x80xf32>
    %50 = math.tanh %49 : vector<1x80xf32>
    %51 = arith.mulf %48, %50 : vector<1x80xf32>
    %52 = tpu.concatenate %51, %0 in 1 : vector<1x80xf32>, vector<1x48xf32> -> vector<1x128xf32>
    %53 = arith.truncf %52 : vector<1x128xf32> to vector<1x128xbf16>
    %c0_20 = arith.constant 0 : index
    %c0_21 = arith.constant 0 : index
    %c0_22 = arith.constant 0 : index
    %54 = vector.load %arg7[%c0_20, %c0_21, %c0_22] : memref<1x128x128xbf16, #tpu.memory_space<vmem>>, vector<1x128x128xbf16>
    %55 = vector.shape_cast %54 : vector<1x128x128xbf16> to vector<128x128xbf16>
    %cst_23 = arith.constant dense<0.000000e+00> : vector<1x128xf32>
    %56 = tpu.matmul %53, %55, %cst_23 {dimension_numbers = #tpu.dot_dimension_numbers<[1], [0], [0], [1], [0, 0, 1, 1], [], []>} : vector<1x128xbf16>, vector<128x128xbf16>, vector<1x128xf32> -> vector<1x128xf32>
    %c0_24 = arith.constant 0 : index
    %c0_25 = arith.constant 0 : index
    %c0_26 = arith.constant 0 : index
    %57 = vector.load %arg8[%c0_24, %c0_25, %c0_26] : memref<1x1x128xf32, #tpu.memory_space<vmem>>, vector<1x1x128xf32>
    %58 = vector.shape_cast %57 : vector<1x1x128xf32> to vector<1x128xf32>
    %59 = arith.addf %56, %58 : vector<1x128xf32>
    %60 = vector.extract_strided_slice %59 {offsets = [0, 0], sizes = [1, 20], strides = [1, 1]} : vector<1x128xf32> to vector<1x20xf32>
    %cst_27 = arith.constant dense<0xFF800000> : vector<1xf32>
    %61 = vector.multi_reduction <maximumf>, %60, %cst_27 [1] : vector<1x20xf32> to vector<1xf32>
    %62 = vector.shape_cast %61 : vector<1xf32> to vector<1x1xf32>
    %63 = vector.broadcast %62 : vector<1x1xf32> to vector<1x20xf32>
    %64 = arith.subf %60, %63 : vector<1x20xf32>
    %65 = math.exp %64 : vector<1x20xf32>
    %cst_28 = arith.constant dense<0.000000e+00> : vector<1xf32>
    %66 = vector.multi_reduction <add>, %65, %cst_28 [1] : vector<1x20xf32> to vector<1xf32>
    %67 = vector.shape_cast %66 : vector<1xf32> to vector<1x1xf32>
    %68 = math.log %67 : vector<1x1xf32>
    %69 = vector.broadcast %68 : vector<1x1xf32> to vector<1x20xf32>
    %70 = arith.subf %64, %69 : vector<1x20xf32>
    %c0_29 = arith.constant 0 : index
    %c0_30 = arith.constant 0 : index
    %c0_31 = arith.constant 0 : index
    %71 = vector.load %arg12[%c0_29, %c0_30, %c0_31] : memref<1x1x20xf32, #tpu.memory_space<vmem>>, vector<1x1x20xf32>
    %72 = vector.shape_cast %71 : vector<1x1x20xf32> to vector<1x20xf32>
    %73 = vector.shape_cast %70 : vector<1x20xf32> to vector<1x1x20xf32>
    tpu.vector_store %arg12[%c0_29, %c0_30, %c0_31], %73 {strides = array<i32>} : memref<1x1x20xf32, #tpu.memory_space<vmem>>, vector<1x1x20xf32>,
    %74 = math.exp %70 : vector<1x20xf32>
    %c0_32 = arith.constant 0 : index
    %c0_33 = arith.constant 0 : index
    %c0_34 = arith.constant 0 : index
    %75 = vector.load %arg9[%c0_32, %c0_33, %c0_34] : memref<1x1x20xf32, #tpu.memory_space<vmem>>, vector<1x1x20xf32>
    %76 = vector.shape_cast %75 : vector<1x1x20xf32> to vector<1x20xf32>
    %77 = arith.mulf %74, %76 : vector<1x20xf32>
    %cst_35 = arith.constant dense<0.000000e+00> : vector<1xf32>
    %78 = vector.multi_reduction <add>, %77, %cst_35 [1] : vector<1x20xf32> to vector<1xf32>
    %79 = vector.shape_cast %78 : vector<1xf32> to vector<1x1xf32>
    %c0_36 = arith.constant 0 : index
    %c0_37 = arith.constant 0 : index
    %80 = vector.load %arg2[%c0_36, %c0_37] : memref<1x1xf32, #tpu.memory_space<vmem>>, vector<1x1xf32>
    %c0_38 = arith.constant 0 : index
    %c0_39 = arith.constant 0 : index
    %c0_40 = arith.constant 0 : index
    %81 = vector.load %arg10[%c0_38, %c0_39, %c0_40] : memref<1x1x1xf32, #tpu.memory_space<vmem>>, vector<1x1x1xf32>
    %82 = vector.shape_cast %81 : vector<1x1x1xf32> to vector<1x1xf32>
    %83 = arith.mulf %80, %82 : vector<1x1xf32>
    %84 = arith.addf %79, %83 : vector<1x1xf32>
    %c0_41 = arith.constant 0 : index
    %c0_42 = arith.constant 0 : index
    %c0_43 = arith.constant 0 : index
    %85 = vector.load %arg11[%c0_41, %c0_42, %c0_43] : memref<1x1x1xf32, #tpu.memory_space<vmem>>, vector<1x1x1xf32>
    %86 = vector.shape_cast %85 : vector<1x1x1xf32> to vector<1x1xf32>
    %87 = arith.addf %84, %86 : vector<1x1xf32>
    %c0_44 = arith.constant 0 : index
    %c0_45 = arith.constant 0 : index
    %c0_46 = arith.constant 0 : index
    %88 = vector.load %arg13[%c0_44, %c0_45, %c0_46] : memref<1x1x1xf32, #tpu.memory_space<vmem>>, vector<1x1x1xf32>
    %89 = vector.shape_cast %88 : vector<1x1x1xf32> to vector<1x1xf32>
    %90 = vector.shape_cast %87 : vector<1x1xf32> to vector<1x1x1xf32>
    tpu.vector_store %arg13[%c0_44, %c0_45, %c0_46], %90 {strides = array<i32>} : memref<1x1x1xf32, #tpu.memory_space<vmem>>, vector<1x1x1xf32>,
    return
  }
  func.func @transform_0(%arg0: i32) -> (i32, i32, i32) {
    %c0_i32 = arith.constant 0 : i32
    %c0_i32_0 = arith.constant 0 : i32
    %c0_i32_1 = arith.constant 0 : i32
    return %arg0, %c0_i32, %c0_i32_0 : i32, i32, i32
  }
  func.func @transform_1(%arg0: i32) -> (i32, i32) {
    %c0_i32 = arith.constant 0 : i32
    %c0_i32_0 = arith.constant 0 : i32
    %c0_i32_1 = arith.constant 0 : i32
    return %c0_i32, %c0_i32_0 : i32, i32
  }
  func.func @transform_2(%arg0: i32) -> (i32, i32, i32) {
    %c0_i32 = arith.constant 0 : i32
    %c0_i32_0 = arith.constant 0 : i32
    %c0_i32_1 = arith.constant 0 : i32
    return %arg0, %c0_i32, %c0_i32_0 : i32, i32, i32
  }
  func.func @transform_3(%arg0: i32) -> (i32, i32, i32) {
    %c0_i32 = arith.constant 0 : i32
    %c0_i32_0 = arith.constant 0 : i32
    %c0_i32_1 = arith.constant 0 : i32
    return %arg0, %c0_i32, %c0_i32_0 : i32, i32, i32
  }
  func.func @transform_4(%arg0: i32) -> (i32, i32, i32) {
    %c0_i32 = arith.constant 0 : i32
    %c0_i32_0 = arith.constant 0 : i32
    %c0_i32_1 = arith.constant 0 : i32
    return %arg0, %c0_i32, %c0_i32_0 : i32, i32, i32
  }
  func.func @transform_5(%arg0: i32) -> (i32, i32, i32) {
    %c0_i32 = arith.constant 0 : i32
    %c0_i32_0 = arith.constant 0 : i32
    %c0_i32_1 = arith.constant 0 : i32
    return %arg0, %c0_i32, %c0_i32_0 : i32, i32, i32
  }
  func.func @transform_6(%arg0: i32) -> (i32, i32, i32) {
    %c0_i32 = arith.constant 0 : i32
    %c0_i32_0 = arith.constant 0 : i32
    %c0_i32_1 = arith.constant 0 : i32
    return %arg0, %c0_i32, %c0_i32_0 : i32, i32, i32
  }
  func.func @transform_7(%arg0: i32) -> (i32, i32, i32) {
    %c0_i32 = arith.constant 0 : i32
    %c0_i32_0 = arith.constant 0 : i32
    %c0_i32_1 = arith.constant 0 : i32
    return %arg0, %c0_i32, %c0_i32_0 : i32, i32, i32
  }
  func.func @transform_8(%arg0: i32) -> (i32, i32, i32) {
    %c0_i32 = arith.constant 0 : i32
    %c0_i32_0 = arith.constant 0 : i32
    %c0_i32_1 = arith.constant 0 : i32
    return %arg0, %c0_i32, %c0_i32_0 : i32, i32, i32
  }
  func.func @transform_9(%arg0: i32) -> (i32, i32, i32) {
    %c0_i32 = arith.constant 0 : i32
    %c0_i32_0 = arith.constant 0 : i32
    %c0_i32_1 = arith.constant 0 : i32
    return %arg0, %c0_i32, %c0_i32_0 : i32, i32, i32
  }
  func.func @transform_10(%arg0: i32) -> (i32, i32, i32) {
    %c0_i32 = arith.constant 0 : i32
    %c0_i32_0 = arith.constant 0 : i32
    %c0_i32_1 = arith.constant 0 : i32
    return %arg0, %c0_i32, %c0_i32_0 : i32, i32, i32
  }
  func.func @transform_11(%arg0: i32) -> (i32, i32, i32) {
    %c0_i32 = arith.constant 0 : i32
    %c0_i32_0 = arith.constant 0 : i32
    %c0_i32_1 = arith.constant 0 : i32
    return %arg0, %c0_i32, %c0_i32_0 : i32, i32, i32
  }
  func.func @transform_12(%arg0: i32) -> (i32, i32, i32) {
    %c0_i32 = arith.constant 0 : i32
    %c0_i32_0 = arith.constant 0 : i32
    %c0_i32_1 = arith.constant 0 : i32
    return %arg0, %c0_i32, %c0_i32_0 : i32, i32, i32
  }
}

</mosaic_0001>

<bundles_post_ra>
// kernel: topnet2_forward.3
= control target key start
LH: loop header
LB: loop body
LE: loop exit
PB: predicated region body
PF: predicated region fallthrough
CT: control target
= control target key end

     0   :  { %s3188_s23 = smov 0   ;;  %s3527_s0 = inlined_call_operand.vmem [shape: f32[5,1,768], index: 0, kind: input, shape index: {}]   ;;  %s3528_s1 = inlined_call_operand.<no memory space> [shape: f32[1,1], index: 1, kind: input, shape index: {}]   ;;  %s3529_s2 = inlined_call_operand.vmem [shape: bf16[5,768,384], index: 2, kind: input, shape index: {}]   ;;  %s3530_s3 = inlined_call_operand.vmem [shape: f32[5,1,384], index: 3, kind: input, shape index: {}]   ;;  %s3531_s4 = inlined_call_operand.vmem [shape: bf16[5,128,384], index: 4, kind: input, shape index: {}]   ;;  %s3532_s5 = inlined_call_operand.vmem [shape: f32[5,1,384], index: 5, kind: input, shape index: {}]   ;;  %s3533_s6 = inlined_call_operand.vmem [shape: bf16[5,128,128], index: 6, kind: input, shape index: {}]   ;;  %s3534_s7 = inlined_call_operand.vmem [shape: f32[5,1,128], index: 7, kind: input, shape index: {}]   ;;  %s3535_s8 = inlined_call_operand.vmem [shape: f32[5,1,20], index: 8, kind: input, shape index: {}]   ;;  %s3536_s9 = inlined_call_operand.vmem [shape: f32[5,1,1], index: 9, kind: input, shape index: {}]   ;;  %s3537_s10 = inlined_call_operand.vmem [shape: f32[5,1,1], index: 10, kind: input, shape index: {}]   ;;  %s3538_s11 = inlined_call_operand.vmem [shape: f32[5,1,20], index: 11, kind: output, shape index: {0}]   ;;  %s3539_s12 = inlined_call_operand.vmem [shape: f32[5,1,1], index: 12, kind: output, shape index: {1}]  }
   0x1   :  { %v18_v0 = vstv %s3528_s1 }
   0x2   :  { %19 = vst [vmem:[#allocation2] sm:$0x1] %v18_v0 }
   0x3 LB: > { %s2471_s24 = sadd.s32 4294967295, %s3112_s23   ;;  %p2475_p0 = scmp.ge.s32.totalorder %s3112_s23, 1  ;;  %s3112_s23 = sphi %s3188_s23, %s25_s23  }
   0x4   : > { %p446_p1 = scmp.lt.s32.totalorder %s3112_s23, 6 }
   0x6   : > { %p447_p2 = pnand %p2475_p0, %p446_p1 }
   0x7   : > { %p523_p3 = scmp.lt.s32.totalorder (!%p447_p2), %s2471_s24, 4  ;;  %v571_v8 = vlaneseq (!%p447_p2)  ;;  %s3114_s18 = smov (!%p447_p2), 96   ;;  %vm1864_vm0 = vcmask (!%p447_p2), 130048   ;;  %vm1867_vm1 = vcmask (!%p447_p2), 654336   ;;  %vm3119_vm3 = vmmov (!%p447_p2), 0  }
   0x8   : > { %450 = sbr.rel (%p447_p2) target bundleno = 2091 (0x82b), region = 64  ;;  %s3118_s25 = smov (!%p447_p2), 16   ;;  %vm3433_vm2 = vmpackc.low (!%p447_p2), %vm1867_vm1, %vm1867_vm1  ;;  %vm2274_vm4 = vcmask (!%p447_p2), 155648   ;;  %vm2301_vm5 = vcmask (!%p447_p2), 0  }
   0x9   : > { %v3214_v11 = vshrl.u32 (!%p447_p2), %v571_v8, 7 }
   0xb   : > { %v3222_v14 = vsub.s32 (!%p447_p2), 1, %v3214_v11  ;;  %v3247_v36 = vsub.s32 (!%p447_p2), 0, %v3214_v11  ;;  %v585_v38 = vsub.s32 (!%p447_p2), 3, %v3214_v11  ;;  %v593_v43 = vsub.s32 (!%p447_p2), 5, %v3214_v11 }
   0xc   : > { %v589_v45 = vsub.s32 (!%p447_p2), 4, %v3214_v11 }
   0xf   : > { %s3543_s24 = smov (!%p523_p3, %s2471_s24), 4 }
  0x10   : > { %s2809_s1 = smul.u32 1152, %s3543_s24  ;;  %s2673_s29 = sshll.u32 %s3543_s24, 6 }
  0x11   : > { %s2808_s28 = smul.u32 6, %s3543_s24  ;;  %s564_s20 = scalar_lea.vmem %s3538_s11, %s3543_s24 }
  0x12   : > { %s3202_s27 = scalar_lea.vmem %s3529_s2, %s2809_s1  ;;  %s2810_s14 = smul.u32 3, %s3543_s24 }
  0x13   : > { %v2836_v1 = vld [vmem:[%s3202_s27 + $0x4] ss:$12 sps:$4 sm:$0xff]   ;;  %v2838_v2 = vld [vmem:[%s3202_s27] ss:$12 sps:$4 sm:$0xff]   ;;  %v2839_v3 = vld [vmem:[%s3202_s27 + $0x1c] ss:$12 sps:$4 sm:$0xff]   ;;  %s526_s13 = scalar_lea.vmem %s3527_s0, %s2808_s28  ;;  %s561_s30 = scalar_lea.vmem %s3537_s10, %s3543_s24 }
  0x14   : > { %1584 = vmatprep.subr.bf16.mxu0 %v2836_v1  ;;  %v2841_v4 = vld [vmem:[%s3202_s27 + $0x18] ss:$12 sps:$4 sm:$0xff]   ;;  %v2842_v5 = vld [vmem:[%s3202_s27 + $0x34] ss:$12 sps:$4 sm:$0xff]   ;;  %v2844_v6 = vld [vmem:[%s3202_s27 + $0x30] ss:$12 sps:$4 sm:$0xff]   ;;  %s535_s17 = scalar_lea.vmem %s3530_s3, %s2810_s14  ;;  %s544_s28 = scalar_lea.vmem %s3532_s5, %s2810_s14 }
  0x15   : > { %1585 = vmatpush1.bf16.msra.mxu0 %v2838_v2  ;;  %v2845_v7 = vld [vmem:[%s3202_s27 + $0x4c] ss:$12 sps:$4 sm:$0xff]   ;;  %v2847_v9 = vld [vmem:[%s3202_s27 + $0x48] ss:$12 sps:$4 sm:$0xff]   ;;  %v2848_v10 = vld [vmem:[%s3202_s27 + $0x64] ss:$12 sps:$4 sm:$0xff]   ;;  %s3473_s14 = scalar_lea.vmem %s3533_s6, %s2673_s29  ;;  %s567_s15 = scalar_lea.vmem %s3539_s12, %s3543_s24 }
  0x16   : > { %1586 = vmatprep.subr.bf16.mxu0 %v2839_v3  ;;  %v2850_v12 = vld [vmem:[%s3202_s27 + $0x60] ss:$12 sps:$4 sm:$0xff]   ;;  %v2851_v13 = vld [vmem:[%s3202_s27 + $0x7c] ss:$12 sps:$4 sm:$0xff]   ;;  %v2853_v15 = vld [vmem:[%s3202_s27 + $0x78] ss:$12 sps:$4 sm:$0xff]  }
  0x17   : > { %v2854_v16 = vld [vmem:[%s3202_s27 + $0x94] ss:$12 sps:$4 sm:$0xff]   ;;  %v2856_v19 = vld [vmem:[%s3202_s27 + $0x90] ss:$12 sps:$4 sm:$0xff]   ;;  %v2857_v20 = vld [vmem:[%s3202_s27 + $0xac] ss:$12 sps:$4 sm:$0xff]  }
  0x18   : > { %v3226_v17 = vld [vmem:[%s526_s13] sm:$0x3f]  ;;  %v2859_v22 = vld [vmem:[%s3202_s27 + $0xa8] ss:$12 sps:$4 sm:$0xff]   ;;  %v2868_v28 = vld [vmem:[%s3202_s27 + $0xf0] ss:$12 sps:$4 sm:$0xff]  }
  0x19   : > { %1587 = vmatpush1.bf16.msra.mxu0 %v2841_v4  ;;  %v578_v18 = vrot.slane %v3226_v17, %v3222_v14  ;;  %v2860_v23 = vld [vmem:[%s3202_s27 + $0xc4] ss:$12 sps:$4 sm:$0xff]   ;;  %v2862_v24 = vld [vmem:[%s3202_s27 + $0xc0] ss:$12 sps:$4 sm:$0xff]   ;;  %v2863_v25 = vld [vmem:[%s3202_s27 + $0xdc] ss:$12 sps:$4 sm:$0xff]   ;;  %v574_v40 = vrot.slane %v3226_v17, %v3247_v36  ;;  %v586_v42 = vrot.slane %v3226_v17, %v585_v38  ;;  %v3260_v46 = vrot.slane %v3226_v17, %v593_v43 }
  0x1a   : > { %1588 = vmatprep.subr.bf16.mxu0 %v2842_v5  ;;  %v2865_v26 = vld [vmem:[%s3202_s27 + $0xd8] ss:$12 sps:$4 sm:$0xff]   ;;  %v2866_v27 = vld [vmem:[%s3202_s27 + $0xf4] ss:$12 sps:$4 sm:$0xff]   ;;  %v2875_v33 = vld [vmem:[%s3202_s27 + $0x13c] ss:$12 sps:$4 sm:$0xff]   ;;  %v3265_v48 = vrot.slane %v3226_v17, %v589_v45 }
  0x1b   : > { %v602_v21 = vpack.c.bf16 %v578_v18, %v578_v18  ;;  %v2869_v29 = vld [vmem:[%s3202_s27 + $0x10c] ss:$12 sps:$4 sm:$0xff]   ;;  %v2871_v30 = vld [vmem:[%s3202_s27 + $0x108] ss:$12 sps:$4 sm:$0xff]   ;;  %v2872_v31 = vld [vmem:[%s3202_s27 + $0x124] ss:$12 sps:$4 sm:$0xff]   ;;  %v3262_v47 = vpack.c.bf16 %v574_v40, %v574_v40  ;;  %v3268_v50 = vpack.c.bf16 %v586_v42, %v586_v42 }
  0x1c   : > { %v2874_v32 = vld [vmem:[%s3202_s27 + $0x120] ss:$12 sps:$4 sm:$0xff]   ;;  %v2877_v34 = vld [vmem:[%s3202_s27 + $0x138] ss:$12 sps:$4 sm:$0xff]   ;;  %v2880_v37 = vld [vmem:[%s3202_s27 + $0x150] ss:$12 sps:$4 sm:$0xff]  }
  0x1d   : > { %1589 = vmatpush1.bf16.msra.mxu0 %v2844_v6  ;;  %1616 = vmatprep.mubr.bf16.mxu0 %v602_v21  ;;  %v2878_v35 = vld [vmem:[%s3202_s27 + $0x154] ss:$12 sps:$4 sm:$0xff]   ;;  %v2881_v39 = vld [vmem:[%s3202_s27 + $0x16c] ss:$12 sps:$4 sm:$0xff]   ;;  %v2886_v44 = vld [vmem:[%s3202_s27 + $0x184] ss:$12 sps:$4 sm:$0xff]  }
  0x1e   : > { %1590 = vmatprep.subr.bf16.mxu0 %v2845_v7  ;;  %1739 = vmatprep.mubr.bf16.mxu1 %v602_v21  ;;  %v2883_v41 = vld [vmem:[%s3202_s27 + $0x168] ss:$12 sps:$4 sm:$0xff]   ;;  %v2884_v49 = vld [vmem:[%s3202_s27 + $0x180] ss:$12 sps:$4 sm:$0xff]   ;;  %v2887_v52 = vld [vmem:[%s3202_s27 + $0x198] ss:$12 sps:$4 sm:$0xff]  }
  0x1f   : > { %v2889_v51 = vld [vmem:[%s3202_s27 + $0x19c] ss:$12 sps:$4 sm:$0xff]   ;;  %v2982_v55 = vld [vmem:[%s3202_s27 + $0xe0] ss:$12 sps:$4 sm:$0xff]   ;;  %v2984_v58 = vld [vmem:[%s3202_s27 + $0xf8] ss:$12 sps:$4 sm:$0xff]  }
  0x20   : > { %v2980_v53 = vld [vmem:[%s3202_s27 + $0xc8] ss:$12 sps:$4 sm:$0xff]   ;;  %v2983_v57 = vld [vmem:[%s3202_s27 + $0x20] ss:$12 sps:$4 sm:$0xff]   ;;  %v2890_v59 = vld [vmem:[%s3202_s27 + $0x1b0] ss:$12 sps:$4 sm:$0xff]  }
  0x21   : > { %1591 = vmatpush1.bf16.msra.mxu0 %v2847_v9  ;;  %v2981_v54 = vld [vmem:[%s3202_s27 + $0x8] ss:$12 sps:$4 sm:$0xff]   ;;  %2674 = vmatprep.subr.bf16.mxu1 %v2980_v53  ;;  %v2895_v60 = vld [vmem:[%s3202_s27 + $0x1cc] ss:$12 sps:$4 sm:$0xff]   ;;  %v2986_v62 = vld [vmem:[%s3202_s27 + $0x110] ss:$12 sps:$4 sm:$0xff]  }
  0x22   : > { %1592 = vmatprep.subr.bf16.mxu0 %v2848_v10  ;;  %v2892_v56 = vld [vmem:[%s3202_s27 + $0x1b4] ss:$12 sps:$4 sm:$0xff]   ;;  %2675 = vmatpush3.bf16.msra.mxu1 %v2981_v54  ;;  %v2985_v61 = vld [vmem:[%s3202_s27 + $0x38] ss:$12 sps:$4 sm:$0xff]   ;;  %v2987_v1 = vld [vmem:[%s3202_s27 + $0x50] ss:$12 sps:$4 sm:$0xff]  }
  0x23   : > { %2676 = vmatprep.subr.bf16.mxu1 %v2982_v55  ;;  %v2893_v63 = vld [vmem:[%s3202_s27 + $0x1c8] ss:$12 sps:$4 sm:$0xff]   ;;  %v2898_v0 = vld [vmem:[%s3202_s27 + $0x1e4] ss:$12 sps:$4 sm:$0xff]   ;;  %v2896_v3 = vld [vmem:[%s3202_s27 + $0x1e0] ss:$12 sps:$4 sm:$0xff]  }
  0x24   : > { %v2988_v2 = vld [vmem:[%s3202_s27 + $0x128] ss:$12 sps:$4 sm:$0xff]   ;;  %v2990_v6 = vld [vmem:[%s3202_s27 + $0x140] ss:$12 sps:$4 sm:$0xff]   ;;  %v2899_v7 = vld [vmem:[%s3202_s27 + $0x1f8] ss:$12 sps:$4 sm:$0xff]  }
  0x25   : > { %1593 = vmatpush1.bf16.msra.mxu0 %v2850_v12  ;;  %v2901_v4 = vld [vmem:[%s3202_s27 + $0x1fc] ss:$12 sps:$4 sm:$0xff]   ;;  %v2904_v8 = vld [vmem:[%s3202_s27 + $0x214] ss:$12 sps:$4 sm:$0xff]   ;;  %v2992_v10 = vld [vmem:[%s3202_s27 + $0x158] ss:$12 sps:$4 sm:$0xff]  }
  0x26   : > { %1594 = vmatprep.subr.bf16.mxu0 %v2851_v13  ;;  %2677 = vmatpush3.bf16.msra.mxu1 %v2983_v57  ;;  %v2989_v5 = vld [vmem:[%s3202_s27 + $0x68] ss:$12 sps:$4 sm:$0xff]   ;;  %v2991_v9 = vld [vmem:[%s3202_s27 + $0x80] ss:$12 sps:$4 sm:$0xff]   ;;  %v2902_v12 = vld [vmem:[%s3202_s27 + $0x210] ss:$12 sps:$4 sm:$0xff]  }
  0x27   : > { %2678 = vmatprep.subr.bf16.mxu1 %v2984_v58  ;;  %v2907_v13 = vld [vmem:[%s3202_s27 + $0x22c] ss:$12 sps:$4 sm:$0xff]   ;;  %v2905_v18 = vld [vmem:[%s3202_s27 + $0x228] ss:$12 sps:$4 sm:$0xff]   ;;  %v3010_v54 = vld [vmem:[%s3202_s27 + $0x2f0] ss:$12 sps:$4 sm:$0xff]  }
  0x28   : > { %v2996_v21 = vld [vmem:[%s3202_s27 + $0x248] ss:$12 sps:$4 sm:$0xff]   ;;  %v3006_v42 = vld [vmem:[%s3202_s27 + $0x2c0] ss:$12 sps:$4 sm:$0xff]   ;;  %v2923_v43 = vld [vmem:[%s3202_s27 + $0x2b8] ss:$12 sps:$4 sm:$0xff]  }
  0x29   : > { %1595 = vmatpush1.bf16.msra.mxu0 %v2853_v15  ;;  %v2993_v15 = vld [vmem:[%s3202_s27 + $0x98] ss:$12 sps:$4 sm:$0xff]   ;;  %v3004_v38 = vld [vmem:[%s3202_s27 + $0x2a8] ss:$12 sps:$4 sm:$0xff]   ;;  %v3007_v45 = vld [vmem:[%s3202_s27 + $0x200] ss:$12 sps:$4 sm:$0xff]  }
  0x2a   : > { %1596 = vmatprep.subr.bf16.mxu0 %v2854_v16  ;;  %2679 = vmatpush3.bf16.msra.mxu1 %v2985_v61  ;;  %v2994_v16 = vld [vmem:[%s3202_s27 + $0x170] ss:$12 sps:$4 sm:$0xff]   ;;  %v3012_v58 = vld [vmem:[%s3202_s27 + $0x3c8] ss:$12 sps:$4 sm:$0xff]   ;;  %s2811_s19 = smul.u32 192, %s3543_s24  ;;  %s3115_s1 = smov 112  }
  0x2b   : > { %2680 = vmatprep.subr.bf16.mxu1 %v2986_v62  ;;  %v2925_v40 = vld [vmem:[%s3202_s27 + $0x2bc] ss:$12 sps:$4 sm:$0xff]   ;;  %v2934_v55 = vld [vmem:[%s3202_s27 + $0x304] ss:$12 sps:$4 sm:$0xff]   ;;  %v3014_v62 = vld [vmem:[%s3202_s27 + $0x3e0] ss:$12 sps:$4 sm:$0xff]  }
  0x2c   : > { %v3013_v61 = vld [vmem:[%s3202_s27 + $0x308] ss:$12 sps:$4 sm:$0xff]   ;;  %s3410_s22 = scalar_lea.vmem %s3531_s4, %s2811_s19 }
  0x2d   : > { %1597 = vmatpush1.bf16.msra.mxu0 %v2856_v19  ;;  %v2910_v19 = vld [vmem:[%s3202_s27 + $0x244] ss:$12 sps:$4 sm:$0xff]  }
  0x2e   : > { %1598 = vmatprep.subr.bf16.mxu0 %v2857_v20  ;;  %2681 = vmatpush3.bf16.msra.mxu1 %v2987_v1  ;;  %v2995_v20 = vld [vmem:[%s3202_s27 + $0xb0] ss:$12 sps:$4 sm:$0xff]   ;;  %v3016_v1 = vld [vmem:[%s3202_s27 + $0x3f8] ss:$12 sps:$4 sm:$0xff]  }
  0x2f   : > { %2682 = vmatprep.subr.bf16.mxu1 %v2988_v2  ;;  %v2938_v2 = vld [vmem:[%s3202_s27 + $0x330] ss:$12 sps:$4 sm:$0xff]  }
  0x31   : > { %1599 = vmatpush1.bf16.msra.mxu0 %v2859_v22  ;;  %v2908_v22 = vld [vmem:[%s3202_s27 + $0x240] ss:$12 sps:$4 sm:$0xff]  }
  0x32   : > { %1600 = vmatprep.subr.bf16.mxu0 %v2860_v23  ;;  %2683 = vmatpush3.bf16.msra.mxu1 %v2989_v5  ;;  %v2913_v23 = vld [vmem:[%s3202_s27 + $0x25c] ss:$12 sps:$4 sm:$0xff]  }
  0x33   : > { %2684 = vmatprep.subr.bf16.mxu1 %v2990_v6  ;;  %v3018_v5 = vld [vmem:[%s3202_s27 + $0x410] ss:$12 sps:$4 sm:$0xff]   ;;  %v2941_v6 = vld [vmem:[%s3202_s27 + $0x348] ss:$12 sps:$4 sm:$0xff]  }
  0x35   : > { %1601 = vmatpush1.bf16.msra.mxu0 %v2862_v24  ;;  %v2997_v24 = vld [vmem:[%s3202_s27 + $0x188] ss:$12 sps:$4 sm:$0xff]  }
  0x36   : > { %1602 = vmatprep.subr.bf16.mxu0 %v2863_v25  ;;  %2685 = vmatpush3.bf16.msra.mxu1 %v2991_v9  ;;  %v2998_v25 = vld [vmem:[%s3202_s27 + $0x260] ss:$12 sps:$4 sm:$0xff]   ;;  %v3020_v9 = vld [vmem:[%s3202_s27 + $0x428] ss:$12 sps:$4 sm:$0xff]  }
  0x37   : > { %2686 = vmatprep.subr.bf16.mxu1 %v2992_v10  ;;  %v2944_v10 = vld [vmem:[%s3202_s27 + $0x360] ss:$12 sps:$4 sm:$0xff]  }
  0x39   : > { %1603 = vmatpush1.bf16.msra.mxu0 %v2865_v26  ;;  %v2911_v26 = vld [vmem:[%s3202_s27 + $0x258] ss:$12 sps:$4 sm:$0xff]  }
  0x3a   : > { %1604 = vmatprep.subr.bf16.mxu0 %v2866_v27  ;;  %2687 = vmatpush3.bf16.msra.mxu1 %v2993_v15  ;;  %v2916_v27 = vld [vmem:[%s3202_s27 + $0x274] ss:$12 sps:$4 sm:$0xff]  }
  0x3b   : > { %2688 = vmatprep.subr.bf16.mxu1 %v2994_v16  ;;  %v3022_v15 = vld [vmem:[%s3202_s27 + $0x440] ss:$12 sps:$4 sm:$0xff]   ;;  %v2947_v16 = vld [vmem:[%s3202_s27 + $0x378] ss:$12 sps:$4 sm:$0xff]  }
  0x3d   : > { %1605 = vmatpush1.bf16.msra.mxu0 %v2868_v28  ;;  %v2999_v28 = vld [vmem:[%s3202_s27 + $0x1a0] ss:$12 sps:$4 sm:$0xff]  }
  0x3e   : > { %1606 = vmatprep.subr.bf16.mxu0 %v2869_v29  ;;  %2689 = vmatpush3.bf16.msra.mxu1 %v2995_v20  ;;  %v3000_v29 = vld [vmem:[%s3202_s27 + $0x278] ss:$12 sps:$4 sm:$0xff]  }
  0x3f   : > { %2696 = vmatprep.subr.bf16.mxu1 %v2996_v21  ;;  %v3024_v20 = vld [vmem:[%s3202_s27 + $0x458] ss:$12 sps:$4 sm:$0xff]   ;;  %v2950_v21 = vld [vmem:[%s3202_s27 + $0x390] ss:$12 sps:$4 sm:$0xff]  }
  0x41   : > { %1607 = vmatpush1.bf16.msra.mxu0 %v2871_v30  ;;  %1740 = vmatmul.mubr.bf16.vlgmr.msra.gmra.mrb[0].mxu1 %v3262_v47  ;;  %v2914_v30 = vld [vmem:[%s3202_s27 + $0x270] ss:$12 sps:$4 sm:$0xff]  }
  0x42   : > { %1608 = vmatprep.subr.bf16.mxu0 %v2872_v31  ;;  %2697 = vmatpush3.bf16.msra.mxu1 %v2997_v24  ;;  %v2919_v31 = vld [vmem:[%s3202_s27 + $0x28c] ss:$12 sps:$4 sm:$0xff]   ;;  %v3026_v24 = vld [vmem:[%s3202_s27 + $0x470] ss:$12 sps:$4 sm:$0xff]  }
  0x43   : > { %1779 = vmatprep.mubr.bf16.mxu1 %v3268_v50  ;;  %2698 = vmatprep.subr.bf16.mxu1 %v2998_v25  ;;  %v2953_v25 = vld [vmem:[%s3202_s27 + $0x3a8] ss:$12 sps:$4 sm:$0xff]  }
  0x45   : > { %1609 = vmatpush1.bf16.msra.mxu0 %v2874_v32  ;;  %v3001_v32 = vld [vmem:[%s3202_s27 + $0x1b8] ss:$12 sps:$4 sm:$0xff]  }
  0x46   : > { %1610 = vmatprep.subr.bf16.mxu0 %v2875_v33  ;;  %2699 = vmatpush3.bf16.msra.mxu1 %v2999_v28  ;;  %v3002_v33 = vld [vmem:[%s3202_s27 + $0x290] ss:$12 sps:$4 sm:$0xff]   ;;  %v2956_v28 = vld [vmem:[%s3202_s27 + $0x3c0] ss:$12 sps:$4 sm:$0xff]  }
  0x47   : > { %2700 = vmatprep.subr.bf16.mxu1 %v3000_v29  ;;  %v2961_v29 = vld [vmem:[%s3202_s27 + $0x3dc] ss:$12 sps:$4 sm:$0xff]  }
  0x49   : > { %1611 = vmatpush1.bf16.msra.mxu0 %v2877_v34  ;;  %v2917_v34 = vld [vmem:[%s3202_s27 + $0x288] ss:$12 sps:$4 sm:$0xff]  }
  0x4a   : > { %1612 = vmatprep.subr.bf16.mxu0 %v2878_v35  ;;  %v2922_v35 = vld [vmem:[%s3202_s27 + $0x2a4] ss:$12 sps:$4 sm:$0xff]   ;;  %2701 = vmatpush3.bf16.msra.mxu1 %v3001_v32  ;;  %v2964_v32 = vld [vmem:[%s3202_s27 + $0x3f4] ss:$12 sps:$4 sm:$0xff]  }
  0x4b   : > { %2702 = vmatprep.subr.bf16.mxu1 %v3002_v33  ;;  %v2962_v33 = vld [vmem:[%s3202_s27 + $0x3f0] ss:$12 sps:$4 sm:$0xff]  }
  0x4d   : > { %1613 = vmatpush1.bf16.msra.mxu0 %v2880_v37  ;;  %v3003_v37 = vld [vmem:[%s3202_s27 + $0x1d0] ss:$12 sps:$4 sm:$0xff]  }
  0x4e   : > { %1614 = vmatprep.subr.bf16.mxu0 %v2881_v39  ;;  %v2920_v39 = vld [vmem:[%s3202_s27 + $0x2a0] ss:$12 sps:$4 sm:$0xff]   ;;  %2703 = vmatpush3.bf16.msra.mxu1 %v3003_v37  ;;  %v2970_v37 = vld [vmem:[%s3202_s27 + $0x424] ss:$12 sps:$4 sm:$0xff]  }
  0x4f   : > { %2704 = vmatprep.subr.bf16.mxu1 %v3004_v38  ;;  %v2973_v38 = vld [vmem:[%s3202_s27 + $0x43c] ss:$12 sps:$4 sm:$0xff]  }
  0x51   : > { %1615 = vmatpush1.bf16.msra.mxu0 %v2883_v41  ;;  %v3005_v41 = vld [vmem:[%s3202_s27 + $0x1e8] ss:$12 sps:$4 sm:$0xff]  }
  0x52   : > { %1625 = vmatprep.subr.bf16.mxu0 %v2886_v44  ;;  %v2928_v44 = vld [vmem:[%s3202_s27 + $0x2d4] ss:$12 sps:$4 sm:$0xff]   ;;  %2705 = vmatpush3.bf16.msra.mxu1 %v3005_v41  ;;  %v2974_v41 = vld [vmem:[%s3202_s27 + $0x450] ss:$12 sps:$4 sm:$0xff]  }
  0x53   : > { %2706 = vmatprep.subr.bf16.mxu1 %v3006_v42  ;;  %v2979_v42 = vld [vmem:[%s3202_s27 + $0x46c] ss:$12 sps:$4 sm:$0xff]  }
  0x54   : > { %1617 = vmatmul.mubr.bf16.vlgmr.msra.gmra.mrb[0].mxu0 %v3262_v47  ;;  %v3330_v47 = vsub.s32 2, %v3214_v11  ;;  %v2929_v11 = vld [vmem:[%s3202_s27 + $0x2e8] ss:$12 sps:$4 sm:$0xff]  }
  0x55   : > { %1626 = vmatpush1.bf16.msra.mxu0 %v2884_v49  ;;  %1657 = vmatprep.mubr.bf16.mxu0 %v3268_v50  ;;  %v3008_v49 = vld [vmem:[%s3202_s27 + $0x2d8] ss:$12 sps:$4 sm:$0xff]   ;;  %v2926_v50 = vld [vmem:[%s3202_s27 + $0x2d0] ss:$12 sps:$4 sm:$0xff]  }
  0x56   : > { %1627 = vmatprep.subr.bf16.mxu0 %v2889_v51  ;;  %v2931_v51 = vld [vmem:[%s3202_s27 + $0x2ec] ss:$12 sps:$4 sm:$0xff]   ;;  %2707 = vmatpush3.bf16.msra.mxu1 %v3007_v45  ;;  %v582_v53 = vrot.slane %v3226_v17, %v3330_v47  ;;  %v606_v17 = vpack.c.bf16 %v3260_v46, %v3260_v46 }
  0x57   : > { %2708 = vmatprep.subr.bf16.mxu1 %v3008_v49  ;;  %v3015_v46 = vld [vmem:[%s3202_s27 + $0x320] ss:$12 sps:$4 sm:$0xff]  }
  0x58   : > { %v603_v57 = vpack.c.bf16 %v582_v53, %v582_v53 }
  0x59   : > { %1628 = vmatpush1.bf16.msra.mxu0 %v2887_v52  ;;  %v3009_v52 = vld [vmem:[%s3202_s27 + $0x218] ss:$12 sps:$4 sm:$0xff]  }
  0x5a   : > { %1629 = vmatprep.subr.bf16.mxu0 %v2892_v56  ;;  %2709 = vmatpush3.bf16.msra.mxu1 %v3009_v52  ;;  %v3011_v56 = vld [vmem:[%s3202_s27 + $0x230] ss:$12 sps:$4 sm:$0xff]  }
  0x5b   : > { %2710 = vmatprep.subr.bf16.mxu1 %v3010_v54 }
  0x5d   : > { %1630 = vmatpush1.bf16.msra.mxu0 %v2890_v59  ;;  %v2932_v59 = vld [vmem:[%s3202_s27 + $0x300] ss:$12 sps:$4 sm:$0xff]  }
  0x5e   : > { %1631 = vmatprep.subr.bf16.mxu0 %v2895_v60  ;;  %v2937_v60 = vld [vmem:[%s3202_s27 + $0x31c] ss:$12 sps:$4 sm:$0xff]   ;;  %2711 = vmatpush3.bf16.msra.mxu1 %v3011_v56 }
  0x5f   : > { %2718 = vmatprep.subr.bf16.mxu1 %v3012_v58 }
  0x61   : > { %1632 = vmatpush1.bf16.msra.mxu0 %v2893_v63  ;;  %v2935_v63 = vld [vmem:[%s3202_s27 + $0x318] ss:$12 sps:$4 sm:$0xff]   ;;  %1780 = vmatmul.mubr.bf16.vlgmr.msra.gmra.mrb[4].mxu1 %v603_v57 }
  0x62   : > { %1633 = vmatprep.subr.bf16.mxu0 %v2898_v0  ;;  %v2940_v0 = vld [vmem:[%s3202_s27 + $0x334] ss:$12 sps:$4 sm:$0xff]   ;;  %2719 = vmatpush3.bf16.msra.mxu1 %v3013_v61 }
  0x63   : > { %1819 = vmatprep.mubr.bf16.mxu1 %v606_v17  ;;  %2720 = vmatprep.subr.bf16.mxu1 %v3014_v62 }
  0x65   : > { %1634 = vmatpush1.bf16.msra.mxu0 %v2896_v3  ;;  %v2943_v3 = vld [vmem:[%s3202_s27 + $0x34c] ss:$12 sps:$4 sm:$0xff]  }
  0x66   : > { %1635 = vmatprep.subr.bf16.mxu0 %v2901_v4  ;;  %2721 = vmatpush3.bf16.msra.mxu1 %v3015_v46  ;;  %v3017_v4 = vld [vmem:[%s3202_s27 + $0x338] ss:$12 sps:$4 sm:$0xff]  }
  0x67   : > { %2722 = vmatprep.subr.bf16.mxu1 %v3016_v1 }
  0x69   : > { %1636 = vmatpush1.bf16.msra.mxu0 %v2899_v7  ;;  %v2946_v7 = vld [vmem:[%s3202_s27 + $0x364] ss:$12 sps:$4 sm:$0xff]  }
  0x6a   : > { %1637 = vmatprep.subr.bf16.mxu0 %v2904_v8  ;;  %2723 = vmatpush3.bf16.msra.mxu1 %v3017_v4  ;;  %v3019_v8 = vld [vmem:[%s3202_s27 + $0x350] ss:$12 sps:$4 sm:$0xff]  }
  0x6b   : > { %2724 = vmatprep.subr.bf16.mxu1 %v3018_v5 }
  0x6d   : > { %1638 = vmatpush1.bf16.msra.mxu0 %v2902_v12  ;;  %v2949_v12 = vld [vmem:[%s3202_s27 + $0x37c] ss:$12 sps:$4 sm:$0xff]  }
  0x6e   : > { %1639 = vmatprep.subr.bf16.mxu0 %v2907_v13  ;;  %2725 = vmatpush3.bf16.msra.mxu1 %v3019_v8  ;;  %v3021_v13 = vld [vmem:[%s3202_s27 + $0x368] ss:$12 sps:$4 sm:$0xff]  }
  0x6f   : > { %2726 = vmatprep.subr.bf16.mxu1 %v3020_v9 }
  0x71   : > { %1640 = vmatpush1.bf16.msra.mxu0 %v2905_v18  ;;  %v2952_v18 = vld [vmem:[%s3202_s27 + $0x394] ss:$12 sps:$4 sm:$0xff]  }
  0x72   : > { %1641 = vmatprep.subr.bf16.mxu0 %v2910_v19  ;;  %2727 = vmatpush3.bf16.msra.mxu1 %v3021_v13  ;;  %v3023_v19 = vld [vmem:[%s3202_s27 + $0x380] ss:$12 sps:$4 sm:$0xff]  }
  0x73   : > { %2728 = vmatprep.subr.bf16.mxu1 %v3022_v15 }
  0x75   : > { %1642 = vmatpush1.bf16.msra.mxu0 %v2908_v22  ;;  %v2955_v22 = vld [vmem:[%s3202_s27 + $0x3ac] ss:$12 sps:$4 sm:$0xff]  }
  0x76   : > { %1643 = vmatprep.subr.bf16.mxu0 %v2913_v23  ;;  %2729 = vmatpush3.bf16.msra.mxu1 %v3023_v19  ;;  %v3025_v23 = vld [vmem:[%s3202_s27 + $0x398] ss:$12 sps:$4 sm:$0xff]  }
  0x77   : > { %2730 = vmatprep.subr.bf16.mxu1 %v3024_v20  ;;  %v3030_v19 = vld [vmem:[%s3410_s22 + $0x4] ss:$12 sps:$4 sm:$0xff]   ;;  %v3033_v20 = vld [vmem:[%s3410_s22 + $0x1c] ss:$12 sps:$4 sm:$0xff]  }
  0x79   : > { %1644 = vmatpush1.bf16.msra.mxu0 %v2911_v26  ;;  %v2958_v26 = vld [vmem:[%s3202_s27 + $0x3c4] ss:$12 sps:$4 sm:$0xff]  }
  0x7a   : > { %1645 = vmatprep.subr.bf16.mxu0 %v2916_v27  ;;  %2731 = vmatpush3.bf16.msra.mxu1 %v3025_v23  ;;  %v3027_v27 = vld [vmem:[%s3202_s27 + $0x3b0] ss:$12 sps:$4 sm:$0xff]   ;;  %v3036_v23 = vld [vmem:[%s3410_s22 + $0x34] ss:$12 sps:$4 sm:$0xff]  }
  0x7b   : > { %2732 = vmatprep.subr.bf16.mxu1 %v3026_v24  ;;  %v3034_v24 = vld [vmem:[%s3410_s22 + $0x30] ss:$12 sps:$4 sm:$0xff]  }
  0x7d   : > { %1646 = vmatpush1.bf16.msra.mxu0 %v2914_v30  ;;  %v605_v30 = vpack.c.bf16 %v3265_v48, %v3265_v48  ;;  %v2968_v48 = vld [vmem:[%s3202_s27 + $0x420] ss:$12 sps:$4 sm:$0xff]  }
  0x7e   : > { %1647 = vmatprep.subr.bf16.mxu0 %v2919_v31  ;;  %2733 = vmatpush3.bf16.msra.mxu1 %v3027_v27  ;;  %v2959_v31 = vld [vmem:[%s3202_s27 + $0x3d8] ss:$12 sps:$4 sm:$0xff]  }
  0x7f   : > { %2047 = vmatprep.subr.bf16.mxu1 %v3030_v19  ;;  %v3042_v27 = vld [vmem:[%s3410_s22 + $0x64] ss:$12 sps:$4 sm:$0xff]  }
  0x81   : > { %1648 = vmatpush1.bf16.msra.mxu0 %v2917_v34  ;;  %1820 = vmatmul.mubr.bf16.vlgmr.msra.gmra.mrb[8].mxu1 %v605_v30  ;;  %v2967_v34 = vld [vmem:[%s3202_s27 + $0x40c] ss:$12 sps:$4 sm:$0xff]  }
  0x82   : > { %1649 = vmatprep.subr.bf16.mxu0 %v2922_v35  ;;  %v2965_v35 = vld [vmem:[%s3202_s27 + $0x408] ss:$12 sps:$4 sm:$0xff]  }
  0x85   : > { %1650 = vmatpush1.bf16.msra.mxu0 %v2920_v39  ;;  %v2971_v39 = vld [vmem:[%s3202_s27 + $0x438] ss:$12 sps:$4 sm:$0xff]  }
  0x86   : > { %1651 = vmatprep.subr.bf16.mxu0 %v2925_v40  ;;  %v2976_v40 = vld [vmem:[%s3202_s27 + $0x454] ss:$12 sps:$4 sm:$0xff]  }
  0x89   : > { %1652 = vmatpush1.bf16.msra.mxu0 %v2923_v43  ;;  %v2977_v43 = vld [vmem:[%s3202_s27 + $0x468] ss:$12 sps:$4 sm:$0xff]   ;;  %s558_s27 = scalar_lea.vmem %s3536_s9, %s3543_s24 }
  0x8a   : > { %1653 = vmatprep.subr.bf16.mxu0 %v2928_v44  ;;  %v799_v44 = vld [vmem:[%s535_s17] sm:$0x7]  ;;  %s552_s17 = scalar_lea.vmem %s3534_s7, %s3543_s24 }
  0x8b   : > { %v1576_v45 = vrot.slane %v799_v44, %v3222_v14 }
  0x8d   : > { %1654 = vmatpush1.bf16.msra.mxu0 %v2926_v50 }
  0x8e   : > { %1655 = vmatprep.subr.bf16.mxu0 %v2931_v51 }
  0x91   : > { %1656 = vmatpush1.bf16.msra.mxu0 %v2929_v11 }
  0x92   : > { %1666 = vmatprep.subr.bf16.mxu0 %v2934_v55  ;;  %v1580_v55 = vrot.slane %v799_v44, %v3330_v47 }
  0x94   : > { %1658 = vmatmul.mubr.bf16.vlgmr.msra.gmra.mrb[0].mxu0 %v603_v57 }
  0x95   : > { %1667 = vmatpush1.bf16.msra.mxu0 %v2932_v59  ;;  %1698 = vmatprep.mubr.bf16.mxu0 %v606_v17 }
  0x96   : > { %1668 = vmatprep.subr.bf16.mxu0 %v2937_v60 }
  0x99   : > { %1669 = vmatpush1.bf16.msra.mxu0 %v2935_v63 }
  0x9a   : > { %1670 = vmatprep.subr.bf16.mxu0 %v2940_v0 }
  0x9d   : > { %1671 = vmatpush1.bf16.msra.mxu0 %v2938_v2 }
  0x9e   : > { %1672 = vmatprep.subr.bf16.mxu0 %v2943_v3 }
  0xa1   : > { %1673 = vmatpush1.bf16.msra.mxu0 %v2941_v6 }
  0xa2   : > { %1674 = vmatprep.subr.bf16.mxu0 %v2946_v7  ;;  %v1572_v7 = vrot.slane %v799_v44, %v3247_v36 }
  0xa5   : > { %1675 = vmatpush1.bf16.msra.mxu0 %v2944_v10 }
  0xa6   : > { %1676 = vmatprep.subr.bf16.mxu0 %v2949_v12 }
  0xa9   : > { %1677 = vmatpush1.bf16.msra.mxu0 %v2947_v16 }
  0xaa   : > { %1678 = vmatprep.subr.bf16.mxu0 %v2952_v18  ;;  %v3028_v18 = vld [vmem:[%s3410_s22] ss:$12 sps:$4 sm:$0xff]  }
  0xab   : > { %2048 = vmatpush1.bf16.msra.mxu1 %v3028_v18 }
  0xac   : > { %2049 = vmatprep.subr.bf16.mxu1 %v3033_v20 }
  0xad   : > { %1679 = vmatpush1.bf16.msra.mxu0 %v2950_v21  ;;  %v3031_v21 = vld [vmem:[%s3410_s22 + $0x18] ss:$12 sps:$4 sm:$0xff]  }
  0xae   : > { %1680 = vmatprep.subr.bf16.mxu0 %v2955_v22 }
  0xaf   : > { %2050 = vmatpush1.bf16.msra.mxu1 %v3031_v21  ;;  %v3061_v21 = vld [vmem:[%s3473_s14 + $0x8] sm:$0xff]  }
  0xb0   : > { %2051 = vmatprep.subr.bf16.mxu1 %v3036_v23  ;;  %v3062_v23 = vld [vmem:[%s3473_s14 + $0x10] sm:$0xff]  }
  0xb1   : > { %1681 = vmatpush1.bf16.msra.mxu0 %v2953_v25  ;;  %v3039_v25 = vld [vmem:[%s3410_s22 + $0x4c] ss:$12 sps:$4 sm:$0xff]  }
  0xb2   : > { %1682 = vmatprep.subr.bf16.mxu0 %v2958_v26  ;;  %v3037_v26 = vld [vmem:[%s3410_s22 + $0x48] ss:$12 sps:$4 sm:$0xff]  }
  0xb3   : > { %2052 = vmatpush1.bf16.msra.mxu1 %v3034_v24  ;;  %v3063_v24 = vld [vmem:[%s3473_s14 + $0x18] sm:$0xff]  }
  0xb4   : > { %2053 = vmatprep.subr.bf16.mxu1 %v3039_v25  ;;  %v3064_v25 = vld [vmem:[%s3473_s14 + $0x20] sm:$0xff]  }
  0xb5   : > { %1683 = vmatpush1.bf16.msra.mxu0 %v2956_v28  ;;  %v3040_v28 = vld [vmem:[%s3410_s22 + $0x60] ss:$12 sps:$4 sm:$0xff]  }
  0xb6   : > { %1684 = vmatprep.subr.bf16.mxu0 %v2961_v29  ;;  %v3045_v29 = vld [vmem:[%s3410_s22 + $0x7c] ss:$12 sps:$4 sm:$0xff]  }
  0xb7   : > { %2054 = vmatpush1.bf16.msra.mxu1 %v3037_v26  ;;  %v3065_v26 = vld [vmem:[%s3473_s14 + $0x28] sm:$0xff]  }
  0xb8   : > { %2055 = vmatprep.subr.bf16.mxu1 %v3042_v27  ;;  %v3066_v27 = vld [vmem:[%s3473_s14 + $0x30] sm:$0xff]  }
  0xb9   : > { %1685 = vmatpush1.bf16.msra.mxu0 %v2959_v31  ;;  %v3048_v31 = vld [vmem:[%s3410_s22 + $0x94] ss:$12 sps:$4 sm:$0xff]  }
  0xba   : > { %1686 = vmatprep.subr.bf16.mxu0 %v2964_v32  ;;  %v3046_v32 = vld [vmem:[%s3410_s22 + $0x90] ss:$12 sps:$4 sm:$0xff]  }
  0xbb   : > { %2056 = vmatpush1.bf16.msra.mxu1 %v3040_v28 }
  0xbc   : > { %2057 = vmatprep.subr.bf16.mxu1 %v3045_v29 }
  0xbd   : > { %1687 = vmatpush1.bf16.msra.mxu0 %v2962_v33 }
  0xbe   : > { %1688 = vmatprep.subr.bf16.mxu0 %v2967_v34 }
  0xc1   : > { %1689 = vmatpush1.bf16.msra.mxu0 %v2965_v35 }
  0xc2   : > { %1690 = vmatprep.subr.bf16.mxu0 %v2970_v37 }
  0xc5   : > { %1691 = vmatpush1.bf16.msra.mxu0 %v2968_v48 }
  0xc6   : > { %1692 = vmatprep.subr.bf16.mxu0 %v2973_v38 }
  0xc9   : > { %1693 = vmatpush1.bf16.msra.mxu0 %v2971_v39  ;;  %v3051_v39 = vld [vmem:[%s3410_s22 + $0xac] ss:$12 sps:$4 sm:$0xff]  }
  0xca   : > { %1694 = vmatprep.subr.bf16.mxu0 %v2976_v40  ;;  %v3049_v40 = vld [vmem:[%s3410_s22 + $0xa8] ss:$12 sps:$4 sm:$0xff]  }
  0xcd   : > { %1695 = vmatpush1.bf16.msra.mxu0 %v2974_v41  ;;  %v3116_v41 = vmov 0  }
  0xce   : > { %1696 = vmatprep.subr.bf16.mxu0 %v2979_v42  ;;  %2079 = vmatprep.mubr.bf16.mxu1 %v3116_v41  ;;  %v3117_v42 = vmov 0.0  }
  0xd1   : > { %1697 = vmatpush1.bf16.msra.mxu0 %v2977_v43 }
  0xd4   : > { %1699 = vmatmul.mubr.bf16.vlgmr.msra.gmra.mrb[0].mxu0 %v605_v30  ;;  %v3043_v30 = vld [vmem:[%s3410_s22 + $0x78] ss:$12 sps:$4 sm:$0xff]  }
  0xd5   : > { %2058 = vmatpush1.bf16.msra.mxu1 %v3043_v30 }
  0xd6   : > { %2059 = vmatprep.subr.bf16.mxu1 %v3048_v31 }
  0xd9   : > { %2060 = vmatpush1.bf16.msra.mxu1 %v3046_v32 }
  0xda   : > { %2061 = vmatprep.subr.bf16.mxu1 %v3051_v39 }
  0xdd   : > { %2062 = vmatpush1.bf16.msra.mxu1 %v3049_v40 }
  0xde   : > { %2758 = vmatprep.subr.bf16.mxu1 %v3117_v42 }
 0x114   : > { %v2690_v11 = vpop.f32.mrb[0].mxu1 }
 0x115   : > { %v2691_v56 = vpop.f32.mrb[1].mxu1 }
 0x116   : > { %v2692_v57 = vadd.f32 %v2691_v56, %v2690_v11  ;;  %v2693_v58 = vpop.f32.mrb[2].mxu1  ;;  %v3052_v56 = vld [vmem:[%s3410_s22 + $0x8] ss:$12 sps:$4 sm:$0xff]  }
 0x117   : > { %v2694_v59 = vpop.f32.mrb[3].mxu1  ;;  %v3053_v58 = vld [vmem:[%s3410_s22 + $0x20] ss:$12 sps:$4 sm:$0xff]  }
 0x118   : > { %v1742_v17 = vadd.f32 %v2692_v57, %v1580_v55  ;;  %v3054_v59 = vld [vmem:[%s3410_s22 + $0x38] ss:$12 sps:$4 sm:$0xff]  }
 0x134   : > { %v2712_v60 = vpop.f32.mrb[4].mxu1 }
 0x135   : > { %v2713_v61 = vpop.f32.mrb[5].mxu1 }
 0x136   : > { %v2714_v62 = vadd.f32 %v2713_v61, %v2712_v60  ;;  %v2715_v63 = vpop.f32.mrb[6].mxu1  ;;  %v3056_v60 = vld [vmem:[%s3410_s22 + $0x68] ss:$12 sps:$4 sm:$0xff]   ;;  %v3057_v61 = vld [vmem:[%s3410_s22 + $0x80] ss:$12 sps:$4 sm:$0xff]  }
 0x137   : > { %v2716_v0 = vpop.f32.mrb[7].mxu1  ;;  %v3059_v63 = vld [vmem:[%s3410_s22 + $0xb0] ss:$12 sps:$4 sm:$0xff]  }
 0x138   : > { %v1782_v46 = vadd.f32 %v2714_v62, %v1742_v17  ;;  %v3055_v17 = vld [vmem:[%s3410_s22 + $0x50] ss:$12 sps:$4 sm:$0xff]   ;;  %v3058_v62 = vld [vmem:[%s3410_s22 + $0x98] ss:$12 sps:$4 sm:$0xff]   ;;  %v1902_v0 = vld [vmem:[%s544_s28] sm:$0x7] }
 0x139   : > { %v2043_v28 = vrot.slane %v1902_v0, %v3330_v47 }
 0x154   : > { %v2734_v1 = vpop.f32.mrb[8].mxu1 }
 0x155   : > { %v2735_v2 = vpop.f32.mrb[9].mxu1 }
 0x156   : > { %v2736_v3 = vadd.f32 %v2735_v2, %v2734_v1  ;;  %v2737_v4 = vpop.f32.mrb[10].mxu1 }
 0x157   : > { %v2738_v5 = vpop.f32.mrb[11].mxu1 }
 0x158   : > { %v1822_v6 = vadd.f32 %v2736_v3, %v1782_v46  ;;  %v2039_v46 = vrot.slane %v1902_v0, %v3222_v14 }
 0x15a   : > { %v2626_v34 = vmul.f32 -1.442695, %v1822_v6 }
 0x1a7   : > { %v1700_v49 = vpop.f32.mrb[0].mxu0 }
 0x1a8   : > { %v1702_v50 = vpop.f32.mrb[1].mxu0  ;;  %v2798_v8 = vadd.f32 %v1700_v49, %v1572_v7 }
 0x1a9   : > { %v3400_v51 = vadd.f32 %v1702_v50, %v1576_v45  ;;  %v1704_v52 = vpop.f32.mrb[2].mxu0 }
 0x1aa   : > { %v1705_v53 = vpop.f32.mrb[3].mxu0  ;;  %v2624_v9 = vmul.f32 -1.442695, %v2798_v8 }
 0x1ab   : > { %3068 = vtanh.f32 %v3400_v51  ;;  %v2625_v33 = vmul.f32 -1.442695, %v3400_v51 }
 0x1ac   : > { %3070 = vpow2.f32 %v2624_v9 }
 0x1b5   : > { %v3069_v54 = vpop.eup %3068 }
 0x1b6   : > { %1847 = vrot.lane.b32.xlu0 %v3069_v54, %s3114_s18  ;;  %v3071_v10 = vpop.eup %3070 }
 0x1b7   : > { %v1830_v12 = vadd.f32 1.0, %v3071_v10 }
 0x1b9   : > { %3072 = vrcp.f32 %v1830_v12  ;;  %v2035_v12 = vrot.slane %v1902_v0, %v3247_v36  ;;  %v3060_v36 = vld [vmem:[%s3473_s14] sm:$0xff]  }
 0x1c3   : > { %v3073_v13 = vpop.eup %3072 }
 0x228   : > { %v1848_v15 = vpop.permute.xlu0 %1847 }
 0x229   : > { %v1850_v16 = vmul.f32 %v3073_v13, %v1848_v15 }
 0x22b   : > { %3074 = vtanh.f32 %v1850_v16 }
 0x22c   : > { %3076 = vpow2.f32 %v2625_v33 }
 0x22d   : > { %3078 = vpow2.f32 %v2626_v34 }
 0x235   : > { %v3075_v22 = vpop.eup %3074 }
 0x236   : > { %1853 = vrot.lane.b32.xlu0 %v3075_v22, %s3115_s1  ;;  %v3077_v35 = vpop.eup %3076 }
 0x237   : > { %v3079_v37 = vpop.eup %3078  ;;  %v1840_v48 = vadd.f32 1.0, %v3077_v35 }
 0x238   : > { %v1841_v38 = vadd.f32 1.0, %v3079_v37  ;;  %v3067_v37 = vld [vmem:[%s3473_s14 + $0x38] sm:$0xff]  }
 0x239   : > { %3080 = vrcp.f32 %v1840_v48 }
 0x23a   : > { %3082 = vrcp.f32 %v1841_v38 }
 0x243   : > { %v3081_v43 = vpop.eup %3080 }
 0x244   : > { %v3083_v44 = vpop.eup %3082 }
 0x2a8   : > { %v1854_v45 = vpop.permute.xlu0 %1853 }
 0x2a9   : > { %v1856_v49 = vmul.f32 %v3081_v43, %v1854_v45  ;;  %v1857_v50 = vmul.f32 %v3083_v44, %v1854_v45 }
 0x2ab   : > { %v2826_v51 = vpack.i.bf16 %v1857_v50, %v1856_v49  ;;  %v2185_v50 = vld [vmem:[%s552_s17] sm:$0x1] }
 0x2ad   : > { %2827 = vrot.lane.b32.xlu1 %v2826_v51, %s3118_s25 }
 0x31f   : > { %v2828_v52 = vpop.permute.xlu1 %2827 }
 0x320   : > { %v2830_v53 = vunpack.i.h.bf16 %v2828_v52  ;;  %v2829_v54 = vunpack.i.l.bf16 %v2828_v52 }
 0x322   : > { %v1865_v11 = vsel %vm1864_vm0, %v2829_v54, %v2830_v53 }
 0x323   : > { %v2652_v57 = vpack.c.bf16 %v1865_v11, %v1865_v11 }
 0x325   : > { %2653 = vmatmul.mubr.msk.bf16.vlgmr.msra.gmra.mrb[12].mxu1 %vm3433_vm2, %v2652_v57 }
 0x326   : > { %2759 = vmatpush3.bf16.msra.mxu1 %v3052_v56  ;;  %2774 = vmatprep.mubr.msk.bf16.mxu1 %vm3119_vm3, %v3117_v42 }
 0x327   : > { %2760 = vmatprep.subr.bf16.mxu1 %v3117_v42 }
 0x32a   : > { %2761 = vmatpush3.bf16.msra.mxu1 %v3053_v58 }
 0x32b   : > { %2762 = vmatprep.subr.bf16.mxu1 %v3117_v42 }
 0x32e   : > { %2763 = vmatpush3.bf16.msra.mxu1 %v3054_v59 }
 0x32f   : > { %2764 = vmatprep.subr.bf16.mxu1 %v3117_v42 }
 0x332   : > { %2765 = vmatpush3.bf16.msra.mxu1 %v3055_v17 }
 0x333   : > { %2766 = vmatprep.subr.bf16.mxu1 %v3117_v42 }
 0x336   : > { %2767 = vmatpush3.bf16.msra.mxu1 %v3056_v60 }
 0x337   : > { %2768 = vmatprep.subr.bf16.mxu1 %v3117_v42 }
 0x33a   : > { %2769 = vmatpush3.bf16.msra.mxu1 %v3057_v61 }
 0x33b   : > { %2770 = vmatprep.subr.bf16.mxu1 %v3117_v42 }
 0x33e   : > { %2771 = vmatpush3.bf16.msra.mxu1 %v3058_v62 }
 0x33f   : > { %2772 = vmatprep.subr.bf16.mxu1 %v3117_v42 }
 0x342   : > { %2773 = vmatpush3.bf16.msra.mxu1 %v3059_v63 }
 0x343   : > { %2778 = vmatprep.subr.bf16.mxu1 %v3117_v42 }
 0x345   : > { %2775 = vmatmul.mubr.msk.bf16.vlgmr.msra.gmra.mrb[16].mxu1 %vm3433_vm2, %v2652_v57 }
 0x346   : > { %2794 = vmatprep.mubr.msk.bf16.mxu1 %vm3119_vm3, %v3117_v42  ;;  %2779 = vmatpush3.bf16.msra.mxu1 %v3060_v36 }
 0x347   : > { %2780 = vmatprep.subr.bf16.mxu1 %v3117_v42 }
 0x34a   : > { %2781 = vmatpush3.bf16.msra.mxu1 %v3061_v21 }
 0x34b   : > { %2782 = vmatprep.subr.bf16.mxu1 %v3117_v42 }
 0x34e   : > { %2783 = vmatpush3.bf16.msra.mxu1 %v3062_v23 }
 0x34f   : > { %2784 = vmatprep.subr.bf16.mxu1 %v3117_v42 }
 0x352   : > { %2785 = vmatpush3.bf16.msra.mxu1 %v3063_v24 }
 0x353   : > { %2786 = vmatprep.subr.bf16.mxu1 %v3117_v42 }
 0x356   : > { %2787 = vmatpush3.bf16.msra.mxu1 %v3064_v25 }
 0x357   : > { %2788 = vmatprep.subr.bf16.mxu1 %v3117_v42 }
 0x35a   : > { %2789 = vmatpush3.bf16.msra.mxu1 %v3065_v26 }
 0x35b   : > { %2790 = vmatprep.subr.bf16.mxu1 %v3117_v42 }
 0x35e   : > { %2791 = vmatpush3.bf16.msra.mxu1 %v3066_v27 }
 0x35f   : > { %2792 = vmatprep.subr.bf16.mxu1 %v3117_v42 }
 0x362   : > { %2793 = vmatpush3.bf16.msra.mxu1 %v3067_v37 }
 0x3f8   : > { %v2081_v1 = vpop.f32.mrb[12].mxu1 }
 0x3f9   : > { %v2083_v2 = vpop.f32.mrb[13].mxu1  ;;  %v2082_v13 = vadd.f32 %v2081_v1, %v2035_v12 }
 0x3fa   : > { %v2084_v3 = vadd.f32 %v2083_v2, %v2039_v46  ;;  %v2085_v4 = vpop.f32.mrb[14].mxu1 }
 0x3fb   : > { %v2086_v5 = vpop.f32.mrb[15].mxu1  ;;  %v2657_v15 = vmul.f32 -1.442695, %v2082_v13  ;;  %v2295_v4 = vld [vmem:[#allocation2] sm:$0x1] }
 0x3fc   : > { %3084 = vtanh.f32 %v2084_v3  ;;  %v2658_v30 = vmul.f32 -1.442695, %v2084_v3  ;;  %v2296_v5 = vld [vmem:[%s558_s27] sm:$0x1] }
 0x3fd   : > { %3086 = vpow2.f32 %v2657_v15 }
 0x406   : > { %v3085_v6 = vpop.eup %3084 }
 0x407   : > { %2148 = vrot.lane.b32.xlu1 %v3085_v6, %s3114_s18  ;;  %v3087_v14 = vpop.eup %3086  ;;  %v2297_v6 = vmul.f32 %v2296_v5, %v2295_v4 }
 0x408   : > { %v2131_v16 = vadd.f32 1.0, %v3087_v14 }
 0x40a   : > { %3088 = vrcp.f32 %v2131_v16 }
 0x414   : > { %v3089_v18 = vpop.eup %3088 }
 0x418   : > { %v2122_v7 = vpop.f32.mrb[16].mxu1 }
 0x419   : > { %v2776_v8 = vpop.f32.mrb[17].mxu1  ;;  %v2123_v29 = vadd.f32 %v2122_v7, %v2043_v28  ;;  %v2299_v7 = vld [vmem:[%s561_s30] sm:$0x1] }
 0x41a   : > { %v2125_v9 = vpop.f32.mrb[18].mxu1 }
 0x41b   : > { %v2777_v10 = vpop.f32.mrb[19].mxu1  ;;  %v2659_v31 = vmul.f32 -1.442695, %v2123_v29 }
 0x479   : > { %v2149_v19 = vpop.permute.xlu1 %2148 }
 0x47a   : > { %v2151_v20 = vmul.f32 %v3089_v18, %v2149_v19 }
 0x47c   : > { %3090 = vtanh.f32 %v2151_v20 }
 0x47d   : > { %3092 = vpow2.f32 %v2658_v30 }
 0x47e   : > { %3094 = vpow2.f32 %v2659_v31 }
 0x486   : > { %v3091_v22 = vpop.eup %3090 }
 0x487   : > { %2154 = vrot.lane.b32.xlu0 %v3091_v22, %s3115_s1  ;;  %v3093_v32 = vpop.eup %3092  ;;  %s555_s1 = scalar_lea.vmem %s3535_s8, %s3543_s24 }
 0x488   : > { %v3095_v33 = vpop.eup %3094  ;;  %v2141_v34 = vadd.f32 1.0, %v3093_v32  ;;  %v2290_v46 = vld [vmem:[%s555_s1] sm:$0x1] }
 0x489   : > { %v2142_v35 = vadd.f32 1.0, %v3095_v33 }
 0x48a   : > { %3096 = vrcp.f32 %v2141_v34 }
 0x48b   : > { %3098 = vrcp.f32 %v2142_v35 }
 0x494   : > { %v3097_v48 = vpop.eup %3096 }
 0x495   : > { %v3099_v38 = vpop.eup %3098 }
 0x4f9   : > { %v2155_v39 = vpop.permute.xlu0 %2154 }
 0x4fa   : > { %v2157_v40 = vmul.f32 %v3097_v48, %v2155_v39  ;;  %v2158_v41 = vmul.f32 %v3099_v38, %v2155_v39 }
 0x4fc   : > { %v2831_v47 = vpack.i.bf16 %v2158_v41, %v2157_v40 }
 0x4fe   : > { %2832 = vrot.lane.b32.xlu1 %v2831_v47, %s3118_s25 }
 0x570   : > { %v2833_v42 = vpop.permute.xlu1 %2832 }
 0x571   : > { %v2835_v43 = vunpack.i.h.bf16 %v2833_v42  ;;  %v2834_v44 = vunpack.i.l.bf16 %v2833_v42 }
 0x573   : > { %v2165_v45 = vsel %vm1864_vm0, %v2834_v44, %v2835_v43 }
 0x574   : > { %v2669_v49 = vpack.c.bf16 %v2165_v45, %v2165_v45 }
 0x576   : > { %2795 = vmatmul.mubr.msk.bf16.vlgmr.msra.gmra.mrb[20].mxu1 %vm3433_vm2, %v2669_v49 }
 0x649   : > { %v2268_v51 = vpop.f32.mrb[20].mxu1 }
 0x64a   : > { %v2269_v52 = vadd.f32 %v2268_v51, %v2185_v50  ;;  %v2796_v53 = vpop.f32.mrb[21].mxu1 }
 0x64b   : > { %v2271_v54 = vpop.f32.mrb[22].mxu1 }
 0x64c   : > { %v2797_v11 = vpop.f32.mrb[23].mxu1  ;;  %v2275_v56 = vsel %vm2274_vm4, %v2269_v52, -inf }
 0x64d   : > { %2276 = vmax.xlane.f32.xlu0 %v2275_v56 }
 0x6da   : > { %v2277_v57 = vpop.xlane.xlu0 %2276 }
 0x6db   : > { %v2278_v58 = vsub.f32 %v2269_v52, %v2277_v57 }
 0x6dd   : > { %v2279_v55 = vmul.f32 1.442695, %v2278_v58 }
 0x6df   : > { %3100 = vpow2.f32 %v2279_v55 }
 0x6e9   : > { %v3101_v59 = vpop.eup %3100 }
 0x6ea   : > { %v2281_v17 = vsel %vm2274_vm4, %v3101_v59, 0.0 }
 0x6eb   : > { %2282 = vadd.xlane.f32.xlu1 %v2281_v17 }
 0x778   : > { %v2283_v60 = vpop.xlane.xlu1 %2282 }
 0x779   : > { %3102 = vlog2.f32 %v2283_v60 }
 0x783   : > { %v3103_v61 = vpop.eup %3102 }
 0x784   : > { %v2285_v62 = vmul.f32 0.6931472, %v3103_v61 }
 0x786   : > { %v2286_v63 = vsub.f32 %v2278_v58, %v2285_v62 }
 0x788   : > { %2287 = vst.msk [vmem:[%s564_s20] sm:$0x1] %vm2274_vm4, %v2286_v63  ;;  %v2288_v0 = vmul.f32 1.442695, %v2286_v63 }
 0x78a   : > { %3104 = vpow2.f32 %v2288_v0 }
 0x794   : > { %v3105_v1 = vpop.eup %3104 }
 0x795   : > { %v2291_v2 = vmul.f32 %v3105_v1, %v2290_v46 }
 0x797   : > { %v2292_v3 = vsel %vm2274_vm4, %v2291_v2, 0.0 }
 0x798   : > { %2293 = vadd.xlane.f32.xlu0 %v2292_v3 }
 0x825   : > { %v2294_v8 = vpop.xlane.xlu0 %2293 }
 0x826   : > { %v2298_v9 = vadd.f32 %v2297_v6, %v2294_v8 }
 0x828   : > { %v2300_v10 = vadd.f32 %v2299_v7, %v2298_v9 }
 0x82a   : > { %2302 = vst.msk [vmem:[%s567_s15] sm:$0x1] %vm2301_vm5, %v2300_v10 }
 0x82b PF: > { %s25_s23 = sadd.s32 1, %s3112_s23  }
 0x82c   : > { %p22_p4 = scmp.ge.s32.totalorder %s25_s23, 7  }
 0x82e   :  { %24 = sbr.rel (!%p22_p4) target bundleno = 3 (0x3), region = 133 }

// kernel: topnet2_forward.2
= control target key start
LH: loop header
LB: loop body
LE: loop exit
PB: predicated region body
PF: predicated region fallthrough
CT: control target
= control target key end

     0   :  { %s3715_s0 = inlined_call_operand.vmem [shape: bf16[1,1152], index: 0, kind: input, shape index: {}]   ;;  %s3716_s1 = inlined_call_operand.hbm [shape: bf16[5,1152,768], index: 1, kind: input, shape index: {}]   ;;  %s3717_s2 = inlined_call_operand.hbm [shape: f32[5,1,768], index: 2, kind: input, shape index: {}]   ;;  %s3718_s3 = inlined_call_operand.vmem [shape: f32[5,1,768], index: 3, kind: output, shape index: {}]  }
   0x1   :  { %3722 = sst [smem:[#allocation10_spill]] %s3716_s1 }
   0x2   :  { %8 = vsyncpa [#allocation3], 0 }
   0x3   :  { %10 = vsyncpa [#allocation3 + $0x1], 0 }
   0x4   :  { %11 = vsyncpa [#allocation5], 0 }
   0x5   :  { %13 = vsyncpa [#allocation5 + $0x1], 0  ;;  %s3248_s12 = smov 0   ;;  %s3250_s13 = smov 0  }
   0x6   :  { %s3252_s14 = smov 0   ;;  %s3254_s15 = smov 0  }
   0x7   :  { %s3256_s16 = smov 0   ;;  %s3258_s17 = smov 0  }
   0x8   :  { %s3260_s18 = smov 0   ;;  %s3262_s19 = smov 0  }
   0x9 LB: > { %s2349_s20 = sadd.s32 4294967295, %s3217_s19   ;;  %s28_s21 = sadd.s32 1, %s3209_s17  ;;  %s3217_s19 = sphi %s3262_s19, %s19_s19   ;;  %s3213_s18 = sphi %s3260_s18, %s3738_s18   ;;  %s3209_s17 = sphi %s3258_s17, %s3737_s17   ;;  %s3205_s16 = sphi %s3256_s16, %s3736_s16   ;;  %s3201_s15 = sphi %s3254_s15, %s3735_s15   ;;  %s3197_s14 = sphi %s3252_s14, %s3734_s14   ;;  %s3193_s13 = sphi %s3250_s13, %s3733_s13   ;;  %s3189_s12 = sphi %s3248_s12, %s3732_s12  }
   0xa   : > { %p29_p0 = scmp.ge.s32.totalorder %s28_s21, 5  ;;  %s31_s22 = sadd.s32 1, %s3213_s18 }
   0xb   : > { %s61_s23 = sadd.s32 1, %s3197_s14  ;;  %p68_p1 = scmp.ne.s32.totalorder %s3197_s14, %s3193_s13 }
   0xc   : > { %s3740_s21 = smov (%p29_p0, %s28_s21), 0  ;;  %s3742_s22 = smov (!%p29_p0, %s31_s22), %s3213_s18 }
   0xd   : > { %3723 = sst [smem:[#allocation8_spill]] %s3740_s21  ;;  %s56_s24 = ssub.s32 %s3209_s17, %s3740_s21 }
   0xe   : > { %p69_p2 = scmp.eq.s32.totalorder %s3217_s19, 0  ;;  %p33_p3 = scmp.ge.s32.totalorder %s3742_s22, 2 }
   0xf   : > { %p74_p4 = scmp.ne.s32.totalorder %s3193_s13, %s3189_s12  ;;  %p75_p6 = scmp.eq.s32.totalorder %s2349_s20, 0 }
  0x10   : > { %p70_p5 = por %p69_p2, %p68_p1  ;;  %s3744_s22 = smov (%p33_p3, %s3742_s22), 0 }
  0x11   : > { %3724 = sst [smem:[#allocation9_spill]] %s3744_s22  ;;  %p3301_p7 = por %p75_p6, %p74_p4 }
  0x12   : > { %s57_s26 = ssub.s32 %s3213_s18, %s3744_s22  ;;  %p2726_p8 = scmp.lt.s32.totalorder %s3217_s19, 10 }
  0x13   : > { %s3725_s25 = scalar_select %p3301_p7, 1, 0 }
  0x14   : > { %s58_s27 = sor.u32 %s57_s26, %s56_s24  ;;  %s3309_s28 = sand.u32 1, %s3197_s14  }
  0x15   : > { %p59_p9 = scmp.eq.s32.totalorder %s58_s27, 0  ;;  %s2708_s29 = smul.u32 1728, %s3309_s28 }
  0x16   : > { %p3312_p10 = pnand %p2726_p8, %p70_p5  ;;  %s162_s5 = smul.u32 3, %s3213_s18 }
  0x17   : > { %s3317_s4 = scalar_select %p59_p9, %s3197_s14, %s61_s23  }
  0x18   : > { %s2709_s6 = smul.u32 864, %s3209_s17  ;;  %s161_s7 = scalar_lea.vmem [#allocation2], %s2708_s29 }
  0x19   : > { %s170_s8 = sshll.u32 %s161_s7, 4  ;;  %s3727_s1 = sld [smem:[#allocation10_spill]]  ;;  %s3321_s8 = int_to_ptr.vmem [resolvable:$true] %s170_s8 }
  0x1a   : > { %s167_s9 = sadd.s32 %s2709_s6, %s162_s5  ;;  %s158_s23 = scalar_lea.sflag [#allocation3], %s3309_s28 }
  0x1b   : > { %s2353_s10 = sshll.u32 %s167_s9, 6  ;;  %p3089_p12 = pneg %p3312_p10 }
  0x1f   : > { %s3328_s20 = scalar_lea.hbm %s3727_s1, %s2353_s10  ;;  %s3092_s29 = scalar_lea.hbm %s3727_s1, 276480 }
  0x20   : > { %s3087_s24 = scalar_lea.hbm %s3328_s20, 27648  ;;  %p3093_p1 = scmp.lt.u32.totalorder %s3328_s20, %s3727_s1 }
  0x21   : > { %p3088_p11 = scmp.ne.s32.totalorder %s3328_s20, %s3087_s24  ;;  %p3094_p2 = scmp.lt.u32.totalorder %s3092_s29, %s3087_s24 }
  0x22   : > { %p3096_p4 = scmp.lt.u32.totalorder %s3087_s24, %s3328_s20 }
  0x23   : > { %p3090_p13 = pnand %p3089_p12, %p3088_p11  ;;  %p3095_p3 = por %p3094_p2, %p3093_p1 }
  0x25   : > { %p3091_p0 = pneg %p3090_p13  ;;  %p3097_p5 = por %p3096_p4, %p3095_p3 }
  0x27   : > { %p3098_p6 = pnand %p3097_p5, %p3091_p0 }
  0x29   : > { %3101 = shalt.err (!%p3098_p6)
}
  0x2a   : > { %s3102_s9 = scalar_lea.vmem %s3321_s8, 27648  ;;  %s3219_s10 = smov [#allocation2]  }
  0x2b   : > { %p3103_p8 = scmp.ne.s32.totalorder %s3321_s8, %s3102_s9  ;;  %s3107_s11 = sshll.u32 %s3219_s10, 4  ;;  %s3108_s11 = int_to_ptr.vmem [resolvable:$false] %s3107_s11 }
  0x2c   : > { %s3109_s12 = scalar_lea.vmem %s3108_s11, 55296  ;;  %p3110_p13 = scmp.lt.s32.totalorder %s3321_s8, %s3108_s11 }
  0x2d   : > { %p3105_p9 = pnand %p3103_p8, %p3089_p12  ;;  %p3111_p1 = scmp.lt.s32.totalorder %s3109_s12, %s3102_s9 }
  0x2f   : > { %p3106_p11 = pneg %p3105_p9  ;;  %p3112_p2 = por %p3111_p1, %p3110_p13 }
  0x31   : > { %p3113_p3 = pnand %p3112_p2, %p3106_p11 }
  0x33   : > { %3116 = shalt.err (!%p3113_p3)
}
  0x34   : > { %s3220_s24 = smov 384   ;;  %s3221_s26 = smov 192  }
  0x35   : > { %s3222_s27 = smov 12   ;;  %p2355_p0 = scmp.ge.s32.totalorder %s3217_s19, 1 }
  0x36   : > { %2722 = dma.hbm_to_vmem [thread:$0]  (!%p3312_p10), %s3328_s20, 27648, %s3321_s8, %s158_s23, %s3220_s24, %s3221_s26, %s3222_s27  }
  0x37   : > { %p199_p4 = scmp.lt.s32.totalorder %s3217_s19, 11  ;;  %s2710_s29 = smul.u32 3, %s3309_s28 }
  0x38   : > { %s2711_s7 = smul.u32 6, %s3209_s17  ;;  %s181_s8 = scalar_lea.sflag [#allocation5], %s3309_s28 }
  0x39   : > { %p3361_p5 = pnand %p2355_p0, %p199_p4  ;;  %s184_s10 = scalar_lea.vmem [#allocation4], %s2710_s29 }
  0x3a   : > { %s190_s9 = sadd.s32 %s2711_s7, %s162_s5  ;;  %s194_s11 = sshll.u32 %s184_s10, 4  ;;  %s3368_s11 = int_to_ptr.vmem [resolvable:$true] %s194_s11 }
  0x3b   : > { %s2354_s12 = sshll.u32 %s190_s9, 4  ;;  %s3122_s5 = scalar_lea.hbm %s3717_s2, 480 }
  0x3c   : > { %s192_s21 = scalar_lea.hbm %s3717_s2, %s2354_s12 }
  0x3d   : > { %s3117_s20 = scalar_lea.hbm %s192_s21, 48  ;;  %p3123_p11 = scmp.lt.u32.totalorder %s192_s21, %s3717_s2 }
  0x3e   : > { %p3118_p6 = scmp.ne.s32.totalorder %s192_s21, %s3117_s20  ;;  %p3124_p13 = scmp.lt.u32.totalorder %s3122_s5, %s3117_s20 }
  0x3f   : > { %p3126_p2 = scmp.lt.u32.totalorder %s3117_s20, %s192_s21 }
  0x40   : > { %p3120_p8 = pnand %p3118_p6, %p3089_p12  ;;  %p3125_p1 = por %p3124_p13, %p3123_p11 }
  0x42   : > { %p3121_p9 = pneg %p3120_p8  ;;  %p3127_p3 = por %p3126_p2, %p3125_p1 }
  0x44   : > { %p3128_p0 = pnand %p3127_p3, %p3121_p9 }
  0x46   : > { %3131 = shalt.err (!%p3128_p0)
}
  0x47   : > { %s3132_s1 = scalar_lea.vmem %s3368_s11, 48  ;;  %s3223_s22 = smov [#allocation4]  }
  0x48   : > { %p3133_p4 = scmp.ne.s32.totalorder %s3368_s11, %s3132_s1  ;;  %s3137_s28 = sshll.u32 %s3223_s22, 4  ;;  %s3138_s28 = int_to_ptr.vmem [resolvable:$false] %s3137_s28 }
  0x49   : > { %s3139_s29 = scalar_lea.vmem %s3138_s28, 96  ;;  %p3140_p7 = scmp.lt.s32.totalorder %s3368_s11, %s3138_s28 }
  0x4a   : > { %p3135_p6 = pnand %p3133_p4, %p3089_p12  ;;  %p3141_p11 = scmp.lt.s32.totalorder %s3139_s29, %s3132_s1 }
  0x4c   : > { %p3136_p8 = pneg %p3135_p6  ;;  %p3142_p13 = por %p3141_p11, %p3140_p7 }
  0x4e   : > { %p3143_p1 = pnand %p3142_p13, %p3136_p8 }
  0x50   : > { %3146 = shalt.err (!%p3143_p1)
}
  0x51   : > { %2725 = dma.hbm_to_vmem [thread:$0]  (!%p3312_p10), %s192_s21, 48, %s3368_s11, %s181_s8  }
  0x52   : > { %203 = sbr.rel (%p3361_p5) target bundleno = 544 (0x220), region = 32  ;;  %s205_s7 = sand.u32 (!%p3361_p5), 1, %s3193_s13  }
  0x53   : > { %s2712_s9 = smul.u32 (!%p3361_p5), 1728, %s205_s7  ;;  %s206_s10 = scalar_lea.sflag (!%p3361_p5), [#allocation3], %s205_s7 }
  0x54   : > { %p3729_p12 = scmp.ne.s32.totalorder (!%p3361_p5), %s3725_s25, 0 }
  0x55   : > { %s3395_s12 = scalar_lea.vmem (!%p3361_p5), [#allocation2], %s2712_s9 }
  0x59   : > { %3180 = dma.done.wait (%p3729_p12), %s206_s10, 27648  }
  0x5a   : > { %3182 = vsyncadd (%p3729_p12), %s206_s10, 4294939648  ;;  %s2713_s20 = smul.u32 3, %s205_s7  ;;  %s215_s30 = scalar_lea.sflag [#allocation5], %s205_s7 }
  0x5c   : > { %s3401_s23 = scalar_lea.vmem [#allocation4], %s2713_s20 }
  0x5d   : > { %3184 = dma.done.wait (%p3729_p12), %s215_s30, 48  }
  0x5e   : > { %3186 = vsyncadd (%p3729_p12), %s215_s30, 4294967248  ;;  %v2798_v0 = vld [vmem:[%s3395_s12 + $0x4] ss:$12 sps:$4 sm:$0xff]   ;;  %v2802_v2 = vld [vmem:[%s3395_s12] ss:$12 sps:$4 sm:$0xff]   ;;  %v558_v38 = vlaneseq  ;;  %vm3227_vm0 = vmmov 0  }
  0x5f   : > { %v2800_v1 = vld [vmem:[%s3395_s12 + $0x184] ss:$12 sps:$4 sm:$0xff]   ;;  %1794 = vmatprep.subr.bf16.mxu1 %v2798_v0  ;;  %v2803_v3 = vld [vmem:[%s3395_s12 + $0x180] ss:$12 sps:$4 sm:$0xff]   ;;  %v2804_v4 = vld [vmem:[%s3395_s12 + $0x1c] ss:$12 sps:$4 sm:$0xff]  }
  0x60   : > { %1835 = vmatprep.subr.bf16.mxu0 %v2800_v1  ;;  %1795 = vmatpush1.bf16.msra.mxu1 %v2802_v2  ;;  %v2806_v5 = vld [vmem:[%s3395_s12 + $0x19c] ss:$12 sps:$4 sm:$0xff]   ;;  %v2808_v6 = vld [vmem:[%s3395_s12 + $0x18] ss:$12 sps:$4 sm:$0xff]   ;;  %v2810_v8 = vld [vmem:[%s3395_s12 + $0x34] ss:$12 sps:$4 sm:$0xff]  }
  0x61   : > { %1836 = vmatpush1.bf16.msra.mxu0 %v2803_v3  ;;  %1796 = vmatprep.subr.bf16.mxu1 %v2804_v4  ;;  %v2809_v7 = vld [vmem:[%s3395_s12 + $0x198] ss:$12 sps:$4 sm:$0xff]   ;;  %v2812_v9 = vld [vmem:[%s3395_s12 + $0x1b4] ss:$12 sps:$4 sm:$0xff]   ;;  %v2814_v10 = vld [vmem:[%s3395_s12 + $0x30] ss:$12 sps:$4 sm:$0xff]  }
  0x62   : > { %1837 = vmatprep.subr.bf16.mxu0 %v2806_v5  ;;  %v2815_v11 = vld [vmem:[%s3395_s12 + $0x1b0] ss:$12 sps:$4 sm:$0xff]   ;;  %v2816_v12 = vld [vmem:[%s3395_s12 + $0x4c] ss:$12 sps:$4 sm:$0xff]   ;;  %v2820_v14 = vld [vmem:[%s3395_s12 + $0x48] ss:$12 sps:$4 sm:$0xff]  }
  0x63   : > { %v2818_v13 = vld [vmem:[%s3395_s12 + $0x1cc] ss:$12 sps:$4 sm:$0xff]   ;;  %v2821_v15 = vld [vmem:[%s3395_s12 + $0x1c8] ss:$12 sps:$4 sm:$0xff]   ;;  %v2822_v16 = vld [vmem:[%s3395_s12 + $0x64] ss:$12 sps:$4 sm:$0xff]  }
  0x64   : > { %1797 = vmatpush1.bf16.msra.mxu1 %v2808_v6  ;;  %v2824_v17 = vld [vmem:[%s3395_s12 + $0x1e4] ss:$12 sps:$4 sm:$0xff]   ;;  %v2826_v18 = vld [vmem:[%s3395_s12 + $0x60] ss:$12 sps:$4 sm:$0xff]   ;;  %v2828_v20 = vld [vmem:[%s3395_s12 + $0x7c] ss:$12 sps:$4 sm:$0xff]  }
  0x65   : > { %1838 = vmatpush1.bf16.msra.mxu0 %v2809_v7  ;;  %1798 = vmatprep.subr.bf16.mxu1 %v2810_v8  ;;  %v2827_v19 = vld [vmem:[%s3395_s12 + $0x1e0] ss:$12 sps:$4 sm:$0xff]   ;;  %v2830_v21 = vld [vmem:[%s3395_s12 + $0x1fc] ss:$12 sps:$4 sm:$0xff]   ;;  %v2832_v22 = vld [vmem:[%s3395_s12 + $0x78] ss:$12 sps:$4 sm:$0xff]  }
  0x66   : > { %1839 = vmatprep.subr.bf16.mxu0 %v2812_v9  ;;  %v2833_v23 = vld [vmem:[%s3395_s12 + $0x1f8] ss:$12 sps:$4 sm:$0xff]   ;;  %v2834_v24 = vld [vmem:[%s3395_s12 + $0x94] ss:$12 sps:$4 sm:$0xff]   ;;  %v2838_v26 = vld [vmem:[%s3395_s12 + $0x90] ss:$12 sps:$4 sm:$0xff]  }
  0x67   : > { %v2836_v25 = vld [vmem:[%s3395_s12 + $0x214] ss:$12 sps:$4 sm:$0xff]   ;;  %v2839_v27 = vld [vmem:[%s3395_s12 + $0x210] ss:$12 sps:$4 sm:$0xff]   ;;  %v2840_v28 = vld [vmem:[%s3395_s12 + $0xac] ss:$12 sps:$4 sm:$0xff]  }
  0x68   : > { %1799 = vmatpush1.bf16.msra.mxu1 %v2814_v10  ;;  %v2842_v29 = vld [vmem:[%s3395_s12 + $0x22c] ss:$12 sps:$4 sm:$0xff]   ;;  %v2844_v30 = vld [vmem:[%s3395_s12 + $0xa8] ss:$12 sps:$4 sm:$0xff]   ;;  %v2846_v32 = vld [vmem:[%s3395_s12 + $0xc4] ss:$12 sps:$4 sm:$0xff]  }
  0x69   : > { %1840 = vmatpush1.bf16.msra.mxu0 %v2815_v11  ;;  %1800 = vmatprep.subr.bf16.mxu1 %v2816_v12  ;;  %v2845_v31 = vld [vmem:[%s3395_s12 + $0x228] ss:$12 sps:$4 sm:$0xff]   ;;  %v2848_v33 = vld [vmem:[%s3395_s12 + $0x244] ss:$12 sps:$4 sm:$0xff]   ;;  %v2850_v34 = vld [vmem:[%s3395_s12 + $0xc0] ss:$12 sps:$4 sm:$0xff]  }
  0x6a   : > { %1841 = vmatprep.subr.bf16.mxu0 %v2818_v13  ;;  %v2851_v35 = vld [vmem:[%s3395_s12 + $0x240] ss:$12 sps:$4 sm:$0xff]   ;;  %v3224_v36 = vmov 1966171168   ;;  %v2852_v39 = vld [vmem:[%s3395_s12 + $0xdc] ss:$12 sps:$4 sm:$0xff]  }
  0x6b   : > { %v556_v37 = vunpack.c.l.s4 %v3224_v36  ;;  %v2854_v40 = vld [vmem:[%s3395_s12 + $0x25c] ss:$12 sps:$4 sm:$0xff]   ;;  %v2856_v41 = vld [vmem:[%s3395_s12 + $0xd8] ss:$12 sps:$4 sm:$0xff]   ;;  %v3447_v43 = vshrl.u32 %v558_v38, 7  ;;  %p252_p7 = scmp.lt.s32.totalorder %s3201_s15, 4 }
  0x6c   : > { %1801 = vmatpush1.bf16.msra.mxu1 %v2820_v14  ;;  %v2857_v44 = vld [vmem:[%s3395_s12 + $0x258] ss:$12 sps:$4 sm:$0xff]   ;;  %v2858_v45 = vld [vmem:[%s3395_s12 + $0xf4] ss:$12 sps:$4 sm:$0xff]   ;;  %v2862_v47 = vld [vmem:[%s3395_s12 + $0xf0] ss:$12 sps:$4 sm:$0xff]  }
  0x6d   : > { %1842 = vmatpush1.bf16.msra.mxu0 %v2821_v15  ;;  %1802 = vmatprep.subr.bf16.mxu1 %v2822_v16  ;;  %v557_v42 = vunpack.c.0.s8 %v556_v37  ;;  %v2860_v46 = vld [vmem:[%s3395_s12 + $0x274] ss:$12 sps:$4 sm:$0xff]   ;;  %v2863_v48 = vld [vmem:[%s3395_s12 + $0x270] ss:$12 sps:$4 sm:$0xff]   ;;  %v2864_v50 = vld [vmem:[%s3395_s12 + $0x10c] ss:$12 sps:$4 sm:$0xff]  }
  0x6e   : > { %1843 = vmatprep.subr.bf16.mxu0 %v2824_v17  ;;  %v2866_v51 = vld [vmem:[%s3395_s12 + $0x28c] ss:$12 sps:$4 sm:$0xff]   ;;  %v2868_v52 = vld [vmem:[%s3395_s12 + $0x108] ss:$12 sps:$4 sm:$0xff]   ;;  %v261_v53 = vld [vmem:[%s3715_s0] sm:$0xff]  ;;  %s251_s8 = smul.u32 3, %s3205_s16 }
  0x6f   : > { %v3455_v49 = vsub.s32 %v557_v42, %v3447_v43  ;;  %v2869_v54 = vld [vmem:[%s3395_s12 + $0x288] ss:$12 sps:$4 sm:$0xff]   ;;  %v2870_v56 = vld [vmem:[%s3395_s12 + $0x124] ss:$12 sps:$4 sm:$0xff]   ;;  %v2874_v59 = vld [vmem:[%s3395_s12 + $0x120] ss:$12 sps:$4 sm:$0xff]   ;;  %v554_v5 = vcombine.high %v261_v53, %v261_v53 }
  0x70   : > { %1803 = vmatpush1.bf16.msra.mxu1 %v2826_v18  ;;  %v2872_v57 = vld [vmem:[%s3395_s12 + $0x2a4] ss:$12 sps:$4 sm:$0xff]   ;;  %v2875_v60 = vld [vmem:[%s3395_s12 + $0x2a0] ss:$12 sps:$4 sm:$0xff]   ;;  %v2876_v62 = vld [vmem:[%s3395_s12 + $0x13c] ss:$12 sps:$4 sm:$0xff]  }
  0x71   : > { %1844 = vmatpush1.bf16.msra.mxu0 %v2827_v19  ;;  %1804 = vmatprep.subr.bf16.mxu1 %v2828_v20  ;;  %v561_v55 = vrot.slane %v261_v53, %v3455_v49  ;;  %v2878_v63 = vld [vmem:[%s3395_s12 + $0x2bc] ss:$12 sps:$4 sm:$0xff]   ;;  %v2880_v1 = vld [vmem:[%s3395_s12 + $0x138] ss:$12 sps:$4 sm:$0xff]   ;;  %v2882_v3 = vld [vmem:[%s3395_s12 + $0x154] ss:$12 sps:$4 sm:$0xff]   ;;  %v3484_v10 = vrot.slane %v554_v5, %v3455_v49 }
  0x72   : > { %1845 = vmatprep.subr.bf16.mxu0 %v2830_v21  ;;  %v2881_v2 = vld [vmem:[%s3395_s12 + $0x2b8] ss:$12 sps:$4 sm:$0xff]   ;;  %v2884_v4 = vld [vmem:[%s3395_s12 + $0x2d4] ss:$12 sps:$4 sm:$0xff]   ;;  %v2886_v6 = vld [vmem:[%s3395_s12 + $0x150] ss:$12 sps:$4 sm:$0xff]  }
  0x73   : > { %v569_v58 = vcombine.high %v561_v55, %v561_v55  ;;  %v2887_v7 = vld [vmem:[%s3395_s12 + $0x2d0] ss:$12 sps:$4 sm:$0xff]   ;;  %v2888_v8 = vld [vmem:[%s3395_s12 + $0x16c] ss:$12 sps:$4 sm:$0xff]   ;;  %v2892_v11 = vld [vmem:[%s3395_s12 + $0x168] ss:$12 sps:$4 sm:$0xff]   ;;  %v3488_v12 = vrot.slane %v561_v55, %v3455_v49  ;;  %v570_v17 = vcombine.high %v3484_v10, %v3484_v10 }
  0x74   : > { %1805 = vmatpush1.bf16.msra.mxu1 %v2832_v22  ;;  %v2890_v9 = vld [vmem:[%s3395_s12 + $0x2ec] ss:$12 sps:$4 sm:$0xff]   ;;  %v2893_v13 = vld [vmem:[%s3395_s12 + $0x2e8] ss:$12 sps:$4 sm:$0xff]   ;;  %v2896_v14 = vld [vmem:[%s3395_s12 + $0x304] ss:$12 sps:$4 sm:$0xff]  }
  0x75   : > { %1846 = vmatpush1.bf16.msra.mxu0 %v2833_v23  ;;  %1806 = vmatprep.subr.bf16.mxu1 %v2834_v24  ;;  %v591_v61 = vrot.slane %v569_v58, %v3455_v49  ;;  %v2897_v15 = vld [vmem:[%s3395_s12 + $0xc8] ss:$12 sps:$4 sm:$0xff]   ;;  %v2894_v16 = vld [vmem:[%s3395_s12 + $0x300] ss:$12 sps:$4 sm:$0xff]   ;;  %v3498_v18 = vcombine.high %v3488_v12, %v3488_v12  ;;  %v3504_v22 = vrot.slane %v570_v17, %v3455_v49  ;;  %v2899_v23 = vld [vmem:[%s3395_s12 + $0x318] ss:$12 sps:$4 sm:$0xff]  }
  0x76   : > { %1847 = vmatprep.subr.bf16.mxu0 %v2836_v25  ;;  %v2898_v19 = vld [vmem:[%s3395_s12 + $0x8] ss:$12 sps:$4 sm:$0xff]   ;;  %v2902_v21 = vld [vmem:[%s3395_s12 + $0xe0] ss:$12 sps:$4 sm:$0xff]   ;;  %v2939_v58 = vld [vmem:[%s3395_s12 + $0x3d8] ss:$12 sps:$4 sm:$0xff]  }
  0x77   : > { %v3472_v0 = vcombine.high %v591_v61, %v591_v61  ;;  %1826 = vmatprep.mubr.bf16.mxu1 %v591_v61  ;;  %v2901_v20 = vld [vmem:[%s3395_s12 + $0x31c] ss:$12 sps:$4 sm:$0xff]   ;;  %v2903_v24 = vld [vmem:[%s3395_s12 + $0x20] ss:$12 sps:$4 sm:$0xff]   ;;  %v2956_v5 = vld [vmem:[%s3395_s12 + $0x424] ss:$12 sps:$4 sm:$0xff]  }
  0x78   : > { %1807 = vmatpush1.bf16.msra.mxu1 %v2838_v26  ;;  %v2906_v25 = vld [vmem:[%s3395_s12 + $0x334] ss:$12 sps:$4 sm:$0xff]   ;;  %v2907_v26 = vld [vmem:[%s3395_s12 + $0xf8] ss:$12 sps:$4 sm:$0xff]   ;;  %v2921_v37 = vld [vmem:[%s3395_s12 + $0x37c] ss:$12 sps:$4 sm:$0xff]  }
  0x79   : > { %1848 = vmatpush1.bf16.msra.mxu0 %v2839_v27  ;;  %1808 = vmatprep.subr.bf16.mxu1 %v2840_v28  ;;  %v2904_v27 = vld [vmem:[%s3395_s12 + $0x330] ss:$12 sps:$4 sm:$0xff]   ;;  %v2908_v28 = vld [vmem:[%s3395_s12 + $0x38] ss:$12 sps:$4 sm:$0xff]   ;;  %v2918_v36 = vld [vmem:[%s3395_s12 + $0x68] ss:$12 sps:$4 sm:$0xff]  }
  0x7a   : > { %1849 = vmatprep.subr.bf16.mxu0 %v2842_v29  ;;  %1867 = vmatprep.mubr.bf16.mxu0 %v3472_v0  ;;  %v2911_v29 = vld [vmem:[%s3395_s12 + $0x34c] ss:$12 sps:$4 sm:$0xff]   ;;  %v2926_v42 = vld [vmem:[%s3395_s12 + $0x394] ss:$12 sps:$4 sm:$0xff]   ;;  %s3746_s15 = smov (!%p252_p7, %s3201_s15), 4  ;;  %p254_p10 = scmp.lt.s32.totalorder %s251_s8, 5 }
  0x7b   : > { %v2937_v53 = vld [vmem:[%s3395_s12 + $0x248] ss:$12 sps:$4 sm:$0xff]   ;;  %v2971_v17 = vld [vmem:[%s3395_s12 + $0x46c] ss:$12 sps:$4 sm:$0xff]   ;;  %s2714_s24 = smul.u32 6, %s3746_s15  ;;  %vm2228_vm1 = vcmp.lt.s32.totalorder %v558_v38, 384 }
  0x7c   : > { %1809 = vmatpush1.bf16.msra.mxu1 %v2844_v30  ;;  %v2912_v30 = vld [vmem:[%s3395_s12 + $0x110] ss:$12 sps:$4 sm:$0xff]   ;;  %v2938_v55 = vld [vmem:[%s3395_s12 + $0x188] ss:$12 sps:$4 sm:$0xff]   ;;  %s3748_s8 = smov (!%p254_p10, %s251_s8), 5 }
  0x7d   : > { %1850 = vmatpush1.bf16.msra.mxu0 %v2845_v31  ;;  %1810 = vmatprep.subr.bf16.mxu1 %v2846_v32  ;;  %v2909_v31 = vld [vmem:[%s3395_s12 + $0x348] ss:$12 sps:$4 sm:$0xff]   ;;  %v2913_v32 = vld [vmem:[%s3395_s12 + $0x50] ss:$12 sps:$4 sm:$0xff]   ;;  %s257_s16 = sadd.s32 %s2714_s24, %s3748_s8 }
  0x7e   : > { %1851 = vmatprep.subr.bf16.mxu0 %v2848_v33  ;;  %v2916_v33 = vld [vmem:[%s3395_s12 + $0x364] ss:$12 sps:$4 sm:$0xff]   ;;  %s258_s27 = scalar_lea.vmem %s3718_s3, %s257_s16 }
  0x80   : > { %1811 = vmatpush1.bf16.msra.mxu1 %v2850_v34  ;;  %v2917_v34 = vld [vmem:[%s3395_s12 + $0x128] ss:$12 sps:$4 sm:$0xff]  }
  0x81   : > { %1852 = vmatpush1.bf16.msra.mxu0 %v2851_v35  ;;  %1812 = vmatprep.subr.bf16.mxu1 %v2852_v39  ;;  %v2914_v35 = vld [vmem:[%s3395_s12 + $0x360] ss:$12 sps:$4 sm:$0xff]  }
  0x82   : > { %1853 = vmatprep.subr.bf16.mxu0 %v2854_v40  ;;  %v2922_v39 = vld [vmem:[%s3395_s12 + $0x140] ss:$12 sps:$4 sm:$0xff]   ;;  %v2919_v40 = vld [vmem:[%s3395_s12 + $0x378] ss:$12 sps:$4 sm:$0xff]  }
  0x84   : > { %1813 = vmatpush1.bf16.msra.mxu1 %v2856_v41  ;;  %v2923_v41 = vld [vmem:[%s3395_s12 + $0x80] ss:$12 sps:$4 sm:$0xff]  }
  0x85   : > { %1854 = vmatpush1.bf16.msra.mxu0 %v2857_v44  ;;  %1814 = vmatprep.subr.bf16.mxu1 %v2858_v45  ;;  %v2927_v44 = vld [vmem:[%s3395_s12 + $0x158] ss:$12 sps:$4 sm:$0xff]   ;;  %v2924_v45 = vld [vmem:[%s3395_s12 + $0x390] ss:$12 sps:$4 sm:$0xff]  }
  0x86   : > { %1855 = vmatprep.subr.bf16.mxu0 %v2860_v46  ;;  %v2928_v46 = vld [vmem:[%s3395_s12 + $0x98] ss:$12 sps:$4 sm:$0xff]  }
  0x88   : > { %1815 = vmatpush1.bf16.msra.mxu1 %v2862_v47  ;;  %v2931_v47 = vld [vmem:[%s3395_s12 + $0x3ac] ss:$12 sps:$4 sm:$0xff]  }
  0x89   : > { %1856 = vmatpush1.bf16.msra.mxu0 %v2863_v48  ;;  %1816 = vmatprep.subr.bf16.mxu1 %v2864_v50  ;;  %v2932_v48 = vld [vmem:[%s3395_s12 + $0x170] ss:$12 sps:$4 sm:$0xff]   ;;  %v2929_v50 = vld [vmem:[%s3395_s12 + $0x3a8] ss:$12 sps:$4 sm:$0xff]  }
  0x8a   : > { %1857 = vmatprep.subr.bf16.mxu0 %v2866_v51  ;;  %v2933_v51 = vld [vmem:[%s3395_s12 + $0xb0] ss:$12 sps:$4 sm:$0xff]  }
  0x8c   : > { %1817 = vmatpush1.bf16.msra.mxu1 %v2868_v52  ;;  %v2936_v52 = vld [vmem:[%s3395_s12 + $0x3c4] ss:$12 sps:$4 sm:$0xff]  }
  0x8d   : > { %1858 = vmatpush1.bf16.msra.mxu0 %v2869_v54  ;;  %1818 = vmatprep.subr.bf16.mxu1 %v2870_v56  ;;  %v2934_v54 = vld [vmem:[%s3395_s12 + $0x3c0] ss:$12 sps:$4 sm:$0xff]   ;;  %v2941_v56 = vld [vmem:[%s3395_s12 + $0x3dc] ss:$12 sps:$4 sm:$0xff]  }
  0x8e   : > { %1859 = vmatprep.subr.bf16.mxu0 %v2872_v57  ;;  %v2942_v57 = vld [vmem:[%s3395_s12 + $0x260] ss:$12 sps:$4 sm:$0xff]  }
  0x90   : > { %1819 = vmatpush1.bf16.msra.mxu1 %v2874_v59  ;;  %v2943_v59 = vld [vmem:[%s3395_s12 + $0x1a0] ss:$12 sps:$4 sm:$0xff]  }
  0x91   : > { %1860 = vmatpush1.bf16.msra.mxu0 %v2875_v60  ;;  %1820 = vmatprep.subr.bf16.mxu1 %v2876_v62  ;;  %v2946_v60 = vld [vmem:[%s3395_s12 + $0x3f4] ss:$12 sps:$4 sm:$0xff]   ;;  %v2944_v62 = vld [vmem:[%s3395_s12 + $0x3f0] ss:$12 sps:$4 sm:$0xff]  }
  0x92   : > { %1861 = vmatprep.subr.bf16.mxu0 %v2878_v63  ;;  %v2948_v63 = vld [vmem:[%s3395_s12 + $0x1b8] ss:$12 sps:$4 sm:$0xff]  }
  0x94   : > { %1821 = vmatpush1.bf16.msra.mxu1 %v2880_v1  ;;  %v2951_v1 = vld [vmem:[%s3395_s12 + $0x40c] ss:$12 sps:$4 sm:$0xff]  }
  0x95   : > { %1862 = vmatpush1.bf16.msra.mxu0 %v2881_v2  ;;  %1822 = vmatprep.subr.bf16.mxu1 %v2882_v3  ;;  %v2952_v2 = vld [vmem:[%s3395_s12 + $0x290] ss:$12 sps:$4 sm:$0xff]   ;;  %v2949_v3 = vld [vmem:[%s3395_s12 + $0x408] ss:$12 sps:$4 sm:$0xff]  }
  0x96   : > { %1863 = vmatprep.subr.bf16.mxu0 %v2884_v4  ;;  %v2953_v4 = vld [vmem:[%s3395_s12 + $0x1d0] ss:$12 sps:$4 sm:$0xff]  }
  0x98   : > { %1823 = vmatpush1.bf16.msra.mxu1 %v2886_v6  ;;  %v2954_v6 = vld [vmem:[%s3395_s12 + $0x420] ss:$12 sps:$4 sm:$0xff]  }
  0x99   : > { %1864 = vmatpush1.bf16.msra.mxu0 %v2887_v7  ;;  %1824 = vmatprep.subr.bf16.mxu1 %v2888_v8  ;;  %v2958_v7 = vld [vmem:[%s3395_s12 + $0x1e8] ss:$12 sps:$4 sm:$0xff]  }
  0x9a   : > { %1865 = vmatprep.subr.bf16.mxu0 %v2890_v9  ;;  %v2961_v8 = vld [vmem:[%s3395_s12 + $0x43c] ss:$12 sps:$4 sm:$0xff]   ;;  %v2962_v9 = vld [vmem:[%s3395_s12 + $0x2c0] ss:$12 sps:$4 sm:$0xff]  }
  0x9c   : > { %1825 = vmatpush1.bf16.msra.mxu1 %v2892_v11  ;;  %v2959_v11 = vld [vmem:[%s3395_s12 + $0x438] ss:$12 sps:$4 sm:$0xff]  }
  0x9d   : > { %1866 = vmatpush1.bf16.msra.mxu0 %v2893_v13  ;;  %2575 = vmatprep.subr.bf16.mxu1 %v2897_v15  ;;  %v2966_v13 = vld [vmem:[%s3395_s12 + $0x454] ss:$12 sps:$4 sm:$0xff]   ;;  %v2964_v15 = vld [vmem:[%s3395_s12 + $0x450] ss:$12 sps:$4 sm:$0xff]  }
  0x9e   : > { %1876 = vmatprep.subr.bf16.mxu0 %v2896_v14  ;;  %v2967_v14 = vld [vmem:[%s3395_s12 + $0x2d8] ss:$12 sps:$4 sm:$0xff]  }
  0x9f   : > { %1827 = vmatmul.mubr.bf16.vlgmr.msra.gmra.mrb[0].mxu1 %v3488_v12 }
  0xa0   : > { %1868 = vmatmul.mubr.bf16.vlgmr.msra.gmra.mrb[0].mxu0 %v3498_v18  ;;  %2576 = vmatpush3.bf16.msra.mxu1 %v2898_v19  ;;  %v2972_v19 = vld [vmem:[%s3395_s12 + $0x2f0] ss:$12 sps:$4 sm:$0xff]  }
  0xa1   : > { %1877 = vmatpush1.bf16.msra.mxu0 %v2894_v16  ;;  %2577 = vmatprep.subr.bf16.mxu1 %v2902_v21  ;;  %v2968_v16 = vld [vmem:[%s3395_s12 + $0x218] ss:$12 sps:$4 sm:$0xff]   ;;  %v2973_v21 = vld [vmem:[%s3395_s12 + $0x230] ss:$12 sps:$4 sm:$0xff]  }
  0xa2   : > { %1878 = vmatprep.subr.bf16.mxu0 %v2901_v20  ;;  %2031 = vmatprep.mubr.bf16.mxu1 %v591_v61  ;;  %v2947_v61 = vld [vmem:[%s3395_s12 + $0x278] ss:$12 sps:$4 sm:$0xff]   ;;  %v2969_v20 = vld [vmem:[%s3395_s12 + $0x468] ss:$12 sps:$4 sm:$0xff]  }
  0xa3   : > { %1908 = vmatprep.mubr.bf16.mxu0 %v3504_v22 }
  0xa4   : > { %2578 = vmatpush3.bf16.msra.mxu1 %v2903_v24  ;;  %v2978_v24 = vld [vmem:[%s3395_s12 + $0x3c8] ss:$12 sps:$4 sm:$0xff]  }
  0xa5   : > { %1879 = vmatpush1.bf16.msra.mxu0 %v2899_v23  ;;  %2579 = vmatprep.subr.bf16.mxu1 %v2907_v26  ;;  %v2977_v23 = vld [vmem:[%s3395_s12 + $0x484] ss:$12 sps:$4 sm:$0xff]   ;;  %v3574_v26 = vrot.slane %v3484_v10, %v3455_v49  ;;  %v2984_v10 = vld [vmem:[%s3395_s12 + $0x320] ss:$12 sps:$4 sm:$0xff]  }
  0xa6   : > { %1880 = vmatprep.subr.bf16.mxu0 %v2906_v25  ;;  %v2975_v25 = vld [vmem:[%s3395_s12 + $0x480] ss:$12 sps:$4 sm:$0xff]  }
  0xa8   : > { %2580 = vmatpush3.bf16.msra.mxu1 %v2908_v28  ;;  %v2982_v28 = vld [vmem:[%s3395_s12 + $0x49c] ss:$12 sps:$4 sm:$0xff]  }
  0xa9   : > { %1881 = vmatpush1.bf16.msra.mxu0 %v2904_v27  ;;  %2581 = vmatprep.subr.bf16.mxu1 %v2912_v30  ;;  %v2979_v27 = vld [vmem:[%s3395_s12 + $0x308] ss:$12 sps:$4 sm:$0xff]   ;;  %v2980_v30 = vld [vmem:[%s3395_s12 + $0x498] ss:$12 sps:$4 sm:$0xff]  }
  0xaa   : > { %1882 = vmatprep.subr.bf16.mxu0 %v2911_v29  ;;  %v2983_v29 = vld [vmem:[%s3395_s12 + $0x3e0] ss:$12 sps:$4 sm:$0xff]  }
  0xac   : > { %2582 = vmatpush3.bf16.msra.mxu1 %v2913_v32  ;;  %v2987_v32 = vld [vmem:[%s3395_s12 + $0x4b4] ss:$12 sps:$4 sm:$0xff]  }
  0xad   : > { %1883 = vmatpush1.bf16.msra.mxu0 %v2909_v31  ;;  %2583 = vmatprep.subr.bf16.mxu1 %v2917_v34  ;;  %v3582_v31 = vcombine.high %v3504_v22, %v3504_v22  ;;  %v2989_v34 = vld [vmem:[%s3395_s12 + $0x338] ss:$12 sps:$4 sm:$0xff]  }
  0xae   : > { %1884 = vmatprep.subr.bf16.mxu0 %v2916_v33  ;;  %v2988_v33 = vld [vmem:[%s3395_s12 + $0x3f8] ss:$12 sps:$4 sm:$0xff]  }
  0xb0   : > { %2584 = vmatpush3.bf16.msra.mxu1 %v2918_v36  ;;  %v2993_v36 = vld [vmem:[%s3395_s12 + $0x410] ss:$12 sps:$4 sm:$0xff]  }
  0xb1   : > { %1885 = vmatpush1.bf16.msra.mxu0 %v2914_v35  ;;  %2585 = vmatprep.subr.bf16.mxu1 %v2922_v39  ;;  %v2992_v35 = vld [vmem:[%s3395_s12 + $0x4cc] ss:$12 sps:$4 sm:$0xff]   ;;  %v2997_v39 = vld [vmem:[%s3395_s12 + $0x4e4] ss:$12 sps:$4 sm:$0xff]  }
  0xb2   : > { %1886 = vmatprep.subr.bf16.mxu0 %v2921_v37  ;;  %v2990_v37 = vld [vmem:[%s3395_s12 + $0x4c8] ss:$12 sps:$4 sm:$0xff]  }
  0xb4   : > { %2586 = vmatpush3.bf16.msra.mxu1 %v2923_v41  ;;  %v2995_v41 = vld [vmem:[%s3395_s12 + $0x4e0] ss:$12 sps:$4 sm:$0xff]  }
  0xb5   : > { %1887 = vmatpush1.bf16.msra.mxu0 %v2919_v40  ;;  %2587 = vmatprep.subr.bf16.mxu1 %v2927_v44  ;;  %v2998_v40 = vld [vmem:[%s3395_s12 + $0x428] ss:$12 sps:$4 sm:$0xff]  }
  0xb6   : > { %1888 = vmatprep.subr.bf16.mxu0 %v2926_v42  ;;  %v2999_v42 = vld [vmem:[%s3395_s12 + $0x368] ss:$12 sps:$4 sm:$0xff]  }
  0xb7   : > { %v3002_v44 = vld [vmem:[%s3395_s12 + $0x4fc] ss:$12 sps:$4 sm:$0xff]  }
  0xb8   : > { %2588 = vmatpush3.bf16.msra.mxu1 %v2928_v46  ;;  %v3000_v46 = vld [vmem:[%s3395_s12 + $0x4f8] ss:$12 sps:$4 sm:$0xff]  }
  0xb9   : > { %1889 = vmatpush1.bf16.msra.mxu0 %v2924_v45  ;;  %2589 = vmatprep.subr.bf16.mxu1 %v2932_v48  ;;  %v3003_v45 = vld [vmem:[%s3395_s12 + $0x440] ss:$12 sps:$4 sm:$0xff]  }
  0xba   : > { %1890 = vmatprep.subr.bf16.mxu0 %v2931_v47  ;;  %v3004_v47 = vld [vmem:[%s3395_s12 + $0x380] ss:$12 sps:$4 sm:$0xff]  }
  0xbb   : > { %v3007_v48 = vld [vmem:[%s3395_s12 + $0x514] ss:$12 sps:$4 sm:$0xff]  }
  0xbc   : > { %2590 = vmatpush3.bf16.msra.mxu1 %v2933_v51  ;;  %v3005_v51 = vld [vmem:[%s3395_s12 + $0x510] ss:$12 sps:$4 sm:$0xff]  }
  0xbd   : > { %1891 = vmatpush1.bf16.msra.mxu0 %v2929_v50  ;;  %2597 = vmatprep.subr.bf16.mxu1 %v2937_v53  ;;  %v3008_v50 = vld [vmem:[%s3395_s12 + $0x458] ss:$12 sps:$4 sm:$0xff]  }
  0xbe   : > { %1892 = vmatprep.subr.bf16.mxu0 %v2936_v52  ;;  %v3009_v52 = vld [vmem:[%s3395_s12 + $0x398] ss:$12 sps:$4 sm:$0xff]  }
  0xbf   : > { %2032 = vmatmul.mubr.bf16.vlgmr.msra.gmra.mrb[4].mxu1 %v3488_v12  ;;  %v2963_v12 = vld [vmem:[%s3395_s12 + $0x200] ss:$12 sps:$4 sm:$0xff]  }
  0xc0   : > { %2598 = vmatpush3.bf16.msra.mxu1 %v2938_v55  ;;  %2071 = vmatprep.mubr.bf16.mxu1 %v3472_v0  ;;  %v2957_v0 = vld [vmem:[%s3395_s12 + $0x2a8] ss:$12 sps:$4 sm:$0xff]   ;;  %v3012_v53 = vld [vmem:[%s3395_s12 + $0x52c] ss:$12 sps:$4 sm:$0xff]  }
  0xc1   : > { %1893 = vmatpush1.bf16.msra.mxu0 %v2934_v54  ;;  %2599 = vmatprep.subr.bf16.mxu1 %v2942_v57  ;;  %v3013_v54 = vld [vmem:[%s3395_s12 + $0x470] ss:$12 sps:$4 sm:$0xff]   ;;  %v3010_v55 = vld [vmem:[%s3395_s12 + $0x528] ss:$12 sps:$4 sm:$0xff]  }
  0xc2   : > { %1894 = vmatprep.subr.bf16.mxu0 %v2941_v56  ;;  %v3014_v56 = vld [vmem:[%s3395_s12 + $0x3b0] ss:$12 sps:$4 sm:$0xff]  }
  0xc3   : > { %v3017_v57 = vld [vmem:[%s3395_s12 + $0x544] ss:$12 sps:$4 sm:$0xff]  }
  0xc4   : > { %2600 = vmatpush3.bf16.msra.mxu1 %v2943_v59  ;;  %v3015_v59 = vld [vmem:[%s3395_s12 + $0x540] ss:$12 sps:$4 sm:$0xff]  }
  0xc5   : > { %1895 = vmatpush1.bf16.msra.mxu0 %v2939_v58  ;;  %2601 = vmatprep.subr.bf16.mxu1 %v2947_v61  ;;  %v3018_v58 = vld [vmem:[%s3395_s12 + $0x548] ss:$12 sps:$4 sm:$0xff]  }
  0xc6   : > { %1896 = vmatprep.subr.bf16.mxu0 %v2946_v60  ;;  %v3019_v60 = vld [vmem:[%s3395_s12 + $0x488] ss:$12 sps:$4 sm:$0xff]  }
  0xc7   : > { %v3022_v61 = vld [vmem:[%s3395_s12 + $0x55c] ss:$12 sps:$4 sm:$0xff]  }
  0xc8   : > { %2602 = vmatpush3.bf16.msra.mxu1 %v2948_v63  ;;  %v3020_v63 = vld [vmem:[%s3395_s12 + $0x558] ss:$12 sps:$4 sm:$0xff]  }
  0xc9   : > { %1897 = vmatpush1.bf16.msra.mxu0 %v2944_v62  ;;  %2603 = vmatprep.subr.bf16.mxu1 %v2952_v2  ;;  %v3023_v62 = vld [vmem:[%s3395_s12 + $0x560] ss:$12 sps:$4 sm:$0xff]  }
  0xca   : > { %1898 = vmatprep.subr.bf16.mxu0 %v2951_v1  ;;  %v3024_v1 = vld [vmem:[%s3395_s12 + $0x4a0] ss:$12 sps:$4 sm:$0xff]  }
  0xcb   : > { %v3027_v2 = vld [vmem:[%s3395_s12 + $0x574] ss:$12 sps:$4 sm:$0xff]  }
  0xcc   : > { %2604 = vmatpush3.bf16.msra.mxu1 %v2953_v4  ;;  %v3025_v4 = vld [vmem:[%s3395_s12 + $0x570] ss:$12 sps:$4 sm:$0xff]  }
  0xcd   : > { %1899 = vmatpush1.bf16.msra.mxu0 %v2949_v3  ;;  %2605 = vmatprep.subr.bf16.mxu1 %v2957_v0  ;;  %v3028_v3 = vld [vmem:[%s3395_s12 + $0x578] ss:$12 sps:$4 sm:$0xff]  }
  0xce   : > { %1900 = vmatprep.subr.bf16.mxu0 %v2956_v5  ;;  %v3029_v5 = vld [vmem:[%s3395_s12 + $0x4b8] ss:$12 sps:$4 sm:$0xff]  }
  0xcf   : > { %v3032_v0 = vld [vmem:[%s3395_s12 + $0x58c] ss:$12 sps:$4 sm:$0xff]  }
  0xd0   : > { %2606 = vmatpush3.bf16.msra.mxu1 %v2958_v7  ;;  %v3030_v7 = vld [vmem:[%s3395_s12 + $0x588] ss:$12 sps:$4 sm:$0xff]  }
  0xd1   : > { %1901 = vmatpush1.bf16.msra.mxu0 %v2954_v6  ;;  %2607 = vmatprep.subr.bf16.mxu1 %v2962_v9  ;;  %v3033_v6 = vld [vmem:[%s3395_s12 + $0x590] ss:$12 sps:$4 sm:$0xff]  }
  0xd2   : > { %1902 = vmatprep.subr.bf16.mxu0 %v2961_v8  ;;  %v3034_v8 = vld [vmem:[%s3395_s12 + $0x4d0] ss:$12 sps:$4 sm:$0xff]  }
  0xd3   : > { %v3037_v9 = vld [vmem:[%s3395_s12 + $0x5a4] ss:$12 sps:$4 sm:$0xff]  }
  0xd4   : > { %2608 = vmatpush3.bf16.msra.mxu1 %v2963_v12  ;;  %v3035_v12 = vld [vmem:[%s3395_s12 + $0x5a0] ss:$12 sps:$4 sm:$0xff]  }
  0xd5   : > { %1903 = vmatpush1.bf16.msra.mxu0 %v2959_v11  ;;  %2609 = vmatprep.subr.bf16.mxu1 %v2967_v14  ;;  %v3038_v11 = vld [vmem:[%s3395_s12 + $0x5a8] ss:$12 sps:$4 sm:$0xff]  }
  0xd6   : > { %1904 = vmatprep.subr.bf16.mxu0 %v2966_v13  ;;  %v3039_v13 = vld [vmem:[%s3395_s12 + $0x4e8] ss:$12 sps:$4 sm:$0xff]  }
  0xd7   : > { %v3042_v14 = vld [vmem:[%s3395_s12 + $0x5bc] ss:$12 sps:$4 sm:$0xff]  }
  0xd8   : > { %2610 = vmatpush3.bf16.msra.mxu1 %v2968_v16  ;;  %v3040_v16 = vld [vmem:[%s3395_s12 + $0x5b8] ss:$12 sps:$4 sm:$0xff]  }
  0xd9   : > { %1905 = vmatpush1.bf16.msra.mxu0 %v2964_v15  ;;  %2611 = vmatprep.subr.bf16.mxu1 %v2972_v19  ;;  %v3043_v15 = vld [vmem:[%s3395_s12 + $0x5c0] ss:$12 sps:$4 sm:$0xff]  }
  0xda   : > { %1906 = vmatprep.subr.bf16.mxu0 %v2971_v17  ;;  %v3044_v17 = vld [vmem:[%s3395_s12 + $0x500] ss:$12 sps:$4 sm:$0xff]  }
  0xdb   : > { %v3047_v19 = vld [vmem:[%s3395_s12 + $0x5d4] ss:$12 sps:$4 sm:$0xff]  }
  0xdc   : > { %2612 = vmatpush3.bf16.msra.mxu1 %v2973_v21  ;;  %v3045_v21 = vld [vmem:[%s3395_s12 + $0x5d0] ss:$12 sps:$4 sm:$0xff]  }
  0xdd   : > { %1907 = vmatpush1.bf16.msra.mxu0 %v2969_v20  ;;  %2619 = vmatprep.subr.bf16.mxu1 %v2978_v24  ;;  %v3048_v20 = vld [vmem:[%s3395_s12 + $0x5d8] ss:$12 sps:$4 sm:$0xff]  }
  0xde   : > { %1917 = vmatprep.subr.bf16.mxu0 %v2977_v23  ;;  %v3049_v23 = vld [vmem:[%s3395_s12 + $0x518] ss:$12 sps:$4 sm:$0xff]  }
  0xdf   : > { %2072 = vmatmul.mubr.bf16.vlgmr.msra.gmra.mrb[8].mxu1 %v3498_v18  ;;  %v2985_v18 = vld [vmem:[%s3395_s12 + $0x4b0] ss:$12 sps:$4 sm:$0xff]   ;;  %v3052_v24 = vld [vmem:[%s3395_s12 + $0x5ec] ss:$12 sps:$4 sm:$0xff]  }
  0xe0   : > { %1909 = vmatmul.mubr.bf16.vlgmr.msra.gmra.mrb[0].mxu0 %v3574_v26  ;;  %2620 = vmatpush3.bf16.msra.mxu1 %v2979_v27  ;;  %v3050_v27 = vld [vmem:[%s3395_s12 + $0x5e8] ss:$12 sps:$4 sm:$0xff]  }
  0xe1   : > { %1918 = vmatpush1.bf16.msra.mxu0 %v2975_v25  ;;  %2621 = vmatprep.subr.bf16.mxu1 %v2983_v29  ;;  %v3053_v25 = vld [vmem:[%s3395_s12 + $0x5f0] ss:$12 sps:$4 sm:$0xff]  }
  0xe2   : > { %1919 = vmatprep.subr.bf16.mxu0 %v2982_v28  ;;  %2111 = vmatprep.mubr.bf16.mxu1 %v3504_v22  ;;  %v2994_v22 = vld [vmem:[%s3395_s12 + $0x350] ss:$12 sps:$4 sm:$0xff]  }
  0xe3   : > { %1949 = vmatprep.mubr.bf16.mxu0 %v3582_v31  ;;  %v3054_v28 = vld [vmem:[%s3395_s12 + $0x530] ss:$12 sps:$4 sm:$0xff]  }
  0xe4   : > { %2622 = vmatpush3.bf16.msra.mxu1 %v2984_v10  ;;  %v3057_v29 = vld [vmem:[%s3395_s12 + $0x604] ss:$12 sps:$4 sm:$0xff]   ;;  %v3058_v10 = vld [vmem:[%s3395_s12 + $0x608] ss:$12 sps:$4 sm:$0xff]  }
  0xe5   : > { %1920 = vmatpush1.bf16.msra.mxu0 %v2980_v30  ;;  %2623 = vmatprep.subr.bf16.mxu1 %v2988_v33  ;;  %v600_v30 = vcombine.high %v3574_v26, %v3574_v26  ;;  %v3061_v33 = vld [vmem:[%s3395_s12 + $0x61c] ss:$12 sps:$4 sm:$0xff]  }
  0xe6   : > { %1921 = vmatprep.subr.bf16.mxu0 %v2987_v32  ;;  %v3225_v32 = vmov 0.0  }
  0xe8   : > { %2624 = vmatpush3.bf16.msra.mxu1 %v2989_v34  ;;  %v3062_v34 = vld [vmem:[%s3395_s12 + $0x620] ss:$12 sps:$4 sm:$0xff]  }
  0xe9   : > { %1922 = vmatpush1.bf16.msra.mxu0 %v2985_v18  ;;  %2625 = vmatprep.subr.bf16.mxu1 %v2993_v36  ;;  %v3059_v18 = vld [vmem:[%s3395_s12 + $0x618] ss:$12 sps:$4 sm:$0xff]   ;;  %v3063_v36 = vld [vmem:[%s3395_s12 + $0x630] ss:$12 sps:$4 sm:$0xff]  }
  0xea   : > { %1923 = vmatprep.subr.bf16.mxu0 %v2992_v35  ;;  %v3226_v35 = vmov 0  }
  0xec   : > { %2626 = vmatpush3.bf16.msra.mxu1 %v2994_v22  ;;  %v3069_v22 = vld [vmem:[%s3395_s12 + $0x64c] ss:$12 sps:$4 sm:$0xff]  }
  0xed   : > { %1924 = vmatpush1.bf16.msra.mxu0 %v2990_v37  ;;  %2627 = vmatprep.subr.bf16.mxu1 %v2998_v40  ;;  %v3066_v37 = vld [vmem:[%s3395_s12 + $0x638] ss:$12 sps:$4 sm:$0xff]   ;;  %v3070_v40 = vld [vmem:[%s3395_s12 + $0x650] ss:$12 sps:$4 sm:$0xff]  }
  0xee   : > { %1925 = vmatprep.subr.bf16.mxu0 %v2997_v39  ;;  %v3067_v39 = vld [vmem:[%s3395_s12 + $0x648] ss:$12 sps:$4 sm:$0xff]  }
  0xf0   : > { %2628 = vmatpush3.bf16.msra.mxu1 %v2999_v42  ;;  %v3071_v42 = vld [vmem:[%s3395_s12 + $0x660] ss:$12 sps:$4 sm:$0xff]  }
  0xf1   : > { %1926 = vmatpush1.bf16.msra.mxu0 %v2995_v41  ;;  %2629 = vmatprep.subr.bf16.mxu1 %v3003_v45  ;;  %v3073_v41 = vld [vmem:[%s3395_s12 + $0x664] ss:$12 sps:$4 sm:$0xff]   ;;  %v3077_v45 = vld [vmem:[%s3395_s12 + $0x67c] ss:$12 sps:$4 sm:$0xff]  }
  0xf2   : > { %1927 = vmatprep.subr.bf16.mxu0 %v3002_v44  ;;  %v3074_v44 = vld [vmem:[%s3395_s12 + $0x668] ss:$12 sps:$4 sm:$0xff]  }
  0xf4   : > { %2630 = vmatpush3.bf16.msra.mxu1 %v3004_v47  ;;  %v3078_v47 = vld [vmem:[%s3395_s12 + $0x680] ss:$12 sps:$4 sm:$0xff]  }
  0xf5   : > { %1928 = vmatpush1.bf16.msra.mxu0 %v3000_v46  ;;  %2631 = vmatprep.subr.bf16.mxu1 %v3008_v50  ;;  %v3075_v46 = vld [vmem:[%s3395_s12 + $0x678] ss:$12 sps:$4 sm:$0xff]   ;;  %v3079_v50 = vld [vmem:[%s3395_s12 + $0x690] ss:$12 sps:$4 sm:$0xff]  }
  0xf6   : > { %1929 = vmatprep.subr.bf16.mxu0 %v3007_v48  ;;  %v3081_v48 = vld [vmem:[%s3395_s12 + $0x694] ss:$12 sps:$4 sm:$0xff]  }
  0xf8   : > { %2632 = vmatpush3.bf16.msra.mxu1 %v3009_v52  ;;  %v3085_v52 = vld [vmem:[%s3395_s12 + $0x6ac] ss:$12 sps:$4 sm:$0xff]  }
  0xf9   : > { %1930 = vmatpush1.bf16.msra.mxu0 %v3005_v51  ;;  %2633 = vmatprep.subr.bf16.mxu1 %v3013_v54  ;;  %v3082_v51 = vld [vmem:[%s3395_s12 + $0x698] ss:$12 sps:$4 sm:$0xff]   ;;  %v3086_v54 = vld [vmem:[%s3395_s12 + $0x6b0] ss:$12 sps:$4 sm:$0xff]  }
  0xfa   : > { %1931 = vmatprep.subr.bf16.mxu0 %v3012_v53  ;;  %v3083_v53 = vld [vmem:[%s3395_s12 + $0x6a8] ss:$12 sps:$4 sm:$0xff]  }
  0xfc   : > { %2634 = vmatpush3.bf16.msra.mxu1 %v3014_v56 }
  0xfd   : > { %1932 = vmatpush1.bf16.msra.mxu0 %v3010_v55  ;;  %2641 = vmatprep.subr.bf16.mxu1 %v3018_v58  ;;  %v2356_v55 = vld.sshfl [vmem:[%s3715_s0 + $0x8] sm:$0x1 pattern:$0x75316420] }
  0xfe   : > { %1933 = vmatprep.subr.bf16.mxu0 %v3017_v57  ;;  %v616_v56 = vrot.slane %v2356_v55, %v3455_v49 }
  0xff   : > { %2112 = vmatmul.mubr.bf16.vlgmr.msra.gmra.mrb[12].mxu1 %v3574_v26  ;;  %v3065_v26 = vld [vmem:[%s3395_s12 + $0x634] ss:$12 sps:$4 sm:$0xff]  }
 0x100   : > { %2642 = vmatpush3.bf16.msra.mxu1 %v3019_v60  ;;  %2151 = vmatprep.mubr.bf16.mxu1 %v3582_v31  ;;  %v3055_v31 = vld [vmem:[%s3395_s12 + $0x600] ss:$12 sps:$4 sm:$0xff]  }
 0x101   : > { %1934 = vmatpush1.bf16.msra.mxu0 %v3015_v59  ;;  %2643 = vmatprep.subr.bf16.mxu1 %v3023_v62 }
 0x102   : > { %1935 = vmatprep.subr.bf16.mxu0 %v3022_v61 }
 0x104   : > { %2644 = vmatpush3.bf16.msra.mxu1 %v3024_v1 }
 0x105   : > { %1936 = vmatpush1.bf16.msra.mxu0 %v3020_v63  ;;  %2645 = vmatprep.subr.bf16.mxu1 %v3028_v3  ;;  %v1789_v3 = vsub.s32 2, %v3447_v43 }
 0x106   : > { %1937 = vmatprep.subr.bf16.mxu0 %v3027_v2 }
 0x108   : > { %2646 = vmatpush3.bf16.msra.mxu1 %v3029_v5 }
 0x109   : > { %1938 = vmatpush1.bf16.msra.mxu0 %v3025_v4  ;;  %2647 = vmatprep.subr.bf16.mxu1 %v3033_v6  ;;  %v551_v4 = vld [vmem:[%s3401_s23] sm:$0x7] }
 0x10a   : > { %1939 = vmatprep.subr.bf16.mxu0 %v3032_v0  ;;  %v1790_v5 = vrot.slane %v551_v4, %v1789_v3 }
 0x10c   : > { %2648 = vmatpush3.bf16.msra.mxu1 %v3034_v8 }
 0x10d   : > { %1940 = vmatpush1.bf16.msra.mxu0 %v3030_v7  ;;  %2649 = vmatprep.subr.bf16.mxu1 %v3038_v11 }
 0x10e   : > { %1941 = vmatprep.subr.bf16.mxu0 %v3037_v9 }
 0x110   : > { %2650 = vmatpush3.bf16.msra.mxu1 %v3039_v13 }
 0x111   : > { %1942 = vmatpush1.bf16.msra.mxu0 %v3035_v12  ;;  %2651 = vmatprep.subr.bf16.mxu1 %v3043_v15 }
 0x112   : > { %1943 = vmatprep.subr.bf16.mxu0 %v3042_v14 }
 0x114   : > { %2652 = vmatpush3.bf16.msra.mxu1 %v3044_v17 }
 0x115   : > { %1944 = vmatpush1.bf16.msra.mxu0 %v3040_v16  ;;  %2653 = vmatprep.subr.bf16.mxu1 %v3048_v20 }
 0x116   : > { %1945 = vmatprep.subr.bf16.mxu0 %v3047_v19 }
 0x118   : > { %2654 = vmatpush3.bf16.msra.mxu1 %v3049_v23 }
 0x119   : > { %1946 = vmatpush1.bf16.msra.mxu0 %v3045_v21  ;;  %2655 = vmatprep.subr.bf16.mxu1 %v3053_v25 }
 0x11a   : > { %1947 = vmatprep.subr.bf16.mxu0 %v3052_v24 }
 0x11c   : > { %2656 = vmatpush3.bf16.msra.mxu1 %v3054_v28  ;;  %v1781_v28 = vsub.s32 0, %v3447_v43 }
 0x11d   : > { %1948 = vmatpush1.bf16.msra.mxu0 %v3050_v27  ;;  %2672 = vmatprep.subr.bf16.mxu1 %v3225_v32 }
 0x11e   : > { %1958 = vmatprep.subr.bf16.mxu0 %v3057_v29  ;;  %v1785_v29 = vsub.s32 1, %v3447_v43 }
 0x11f   : > { %2152 = vmatmul.mubr.bf16.vlgmr.msra.gmra.mrb[16].mxu1 %v600_v30 }
 0x120   : > { %1950 = vmatmul.mubr.bf16.vlgmr.msra.gmra.mrb[0].mxu0 %v600_v30  ;;  %2673 = vmatpush3.bf16.msra.mxu1 %v3058_v10  ;;  %v1782_v30 = vrot.slane %v551_v4, %v1781_v28 }
 0x121   : > { %1959 = vmatpush1.bf16.msra.mxu0 %v3055_v31  ;;  %2674 = vmatprep.subr.bf16.mxu1 %v3225_v32  ;;  %v1786_v31 = vrot.slane %v551_v4, %v1785_v29 }
 0x122   : > { %1960 = vmatprep.subr.bf16.mxu0 %v3061_v33  ;;  %1990 = vmatprep.mubr.bf16.mxu0 %v3226_v35 }
 0x123   : > { %2688 = vmatprep.mubr.msk.bf16.mxu1 %vm3227_vm0, %v3225_v32 }
 0x124   : > { %2675 = vmatpush3.bf16.msra.mxu1 %v3062_v34 }
 0x125   : > { %1961 = vmatpush1.bf16.msra.mxu0 %v3059_v18  ;;  %2676 = vmatprep.subr.bf16.mxu1 %v3225_v32 }
 0x126   : > { %1962 = vmatprep.subr.bf16.mxu0 %v3065_v26 }
 0x128   : > { %2677 = vmatpush3.bf16.msra.mxu1 %v3066_v37 }
 0x129   : > { %1963 = vmatpush1.bf16.msra.mxu0 %v3063_v36  ;;  %2678 = vmatprep.subr.bf16.mxu1 %v3225_v32 }
 0x12a   : > { %1964 = vmatprep.subr.bf16.mxu0 %v3069_v22 }
 0x12c   : > { %2679 = vmatpush3.bf16.msra.mxu1 %v3070_v40 }
 0x12d   : > { %1965 = vmatpush1.bf16.msra.mxu0 %v3067_v39  ;;  %2680 = vmatprep.subr.bf16.mxu1 %v3225_v32 }
 0x12e   : > { %1966 = vmatprep.subr.bf16.mxu0 %v3073_v41 }
 0x130   : > { %2681 = vmatpush3.bf16.msra.mxu1 %v3074_v44 }
 0x131   : > { %1967 = vmatpush1.bf16.msra.mxu0 %v3071_v42  ;;  %2682 = vmatprep.subr.bf16.mxu1 %v3225_v32 }
 0x132   : > { %1968 = vmatprep.subr.bf16.mxu0 %v3077_v45 }
 0x134   : > { %2683 = vmatpush3.bf16.msra.mxu1 %v3078_v47 }
 0x135   : > { %1969 = vmatpush1.bf16.msra.mxu0 %v3075_v46  ;;  %2684 = vmatprep.subr.bf16.mxu1 %v3225_v32 }
 0x136   : > { %1970 = vmatprep.subr.bf16.mxu0 %v3081_v48 }
 0x138   : > { %2685 = vmatpush3.bf16.msra.mxu1 %v3082_v51 }
 0x139   : > { %1971 = vmatpush1.bf16.msra.mxu0 %v3079_v50  ;;  %2686 = vmatprep.subr.bf16.mxu1 %v3225_v32 }
 0x13a   : > { %1972 = vmatprep.subr.bf16.mxu0 %v3085_v52 }
 0x13c   : > { %2687 = vmatpush3.bf16.msra.mxu1 %v3086_v54 }
 0x13d   : > { %1973 = vmatpush1.bf16.msra.mxu0 %v3083_v53 }
 0x13f   : > { %2689 = vmatmul.mubr.bf16.vlgmr.msra.gmra.mrb[20].mxu1 %v616_v56 }
 0x140   : > { %1991 = vmatmul.mubr.bf16.vlgmr.msra.gmra.mrb[0].mxu0 %v616_v56 }
 0x172   : > { %v1828_v57 = vpop.f32.mrb[0].mxu1 }
 0x173   : > { %v1830_v58 = vpop.f32.mrb[1].mxu1  ;;  %v1829_v10 = vadd.f32 %v1828_v57, %v1782_v30 }
 0x174   : > { %v1832_v59 = vpop.f32.mrb[2].mxu1  ;;  %v1831_v32 = vadd.f32 %v1830_v58, %v1786_v31 }
 0x175   : > { %v1833_v60 = vpop.f32.mrb[3].mxu1 }
 0x192   : > { %v2591_v61 = vpop.f32.mrb[4].mxu1 }
 0x193   : > { %v2592_v62 = vpop.f32.mrb[5].mxu1 }
 0x194   : > { %v2593_v63 = vadd.f32 %v2592_v62, %v2591_v61  ;;  %v2594_v1 = vpop.f32.mrb[6].mxu1 }
 0x195   : > { %v2595_v2 = vpop.f32.mrb[7].mxu1 }
 0x196   : > { %v2034_v7 = vadd.f32 %v2593_v63, %v1790_v5 }
 0x1b2   : > { %v2613_v0 = vpop.f32.mrb[8].mxu1 }
 0x1b3   : > { %v2614_v6 = vpop.f32.mrb[9].mxu1 }
 0x1b4   : > { %v2615_v8 = vadd.f32 %v2614_v6, %v2613_v0  ;;  %v2616_v9 = vpop.f32.mrb[10].mxu1 }
 0x1b5   : > { %v2617_v11 = vpop.f32.mrb[11].mxu1 }
 0x1b6   : > { %v2074_v12 = vadd.f32 %v2615_v8, %v2034_v7 }
 0x1d2   : > { %v2635_v13 = vpop.f32.mrb[12].mxu1 }
 0x1d3   : > { %v2636_v14 = vpop.f32.mrb[13].mxu1 }
 0x1d4   : > { %v2637_v15 = vadd.f32 %v2636_v14, %v2635_v13  ;;  %v2638_v16 = vpop.f32.mrb[14].mxu1 }
 0x1d5   : > { %v2639_v17 = vpop.f32.mrb[15].mxu1 }
 0x1d6   : > { %v2114_v19 = vadd.f32 %v2637_v15, %v2074_v12 }
 0x1f2   : > { %v2657_v20 = vpop.f32.mrb[16].mxu1 }
 0x1f3   : > { %v2658_v21 = vpop.f32.mrb[17].mxu1 }
 0x1f4   : > { %v2659_v23 = vadd.f32 %v2658_v21, %v2657_v20  ;;  %v2660_v24 = vpop.f32.mrb[18].mxu1 }
 0x1f5   : > { %v2661_v25 = vpop.f32.mrb[19].mxu1 }
 0x1f6   : > { %v2154_v27 = vadd.f32 %v2659_v23, %v2114_v19 }
 0x212   : > { %v2193_v18 = vpop.f32.mrb[20].mxu1 }
 0x213   : > { %v1992_v33 = vpop.f32.mrb[0].mxu0  ;;  %v2194_v26 = vadd.f32 %v2193_v18, %v2154_v27  ;;  %v2690_v36 = vpop.f32.mrb[21].mxu1 }
 0x214   : > { %v2693_v34 = vadd.f32 %v1992_v33, %v1829_v10  ;;  %v1994_v35 = vpop.f32.mrb[1].mxu0  ;;  %v2196_v39 = vpop.f32.mrb[22].mxu1 }
 0x215   : > { %v2695_v37 = vadd.f32 %v1994_v35, %v1831_v32  ;;  %v1996_v22 = vpop.f32.mrb[2].mxu0  ;;  %v2691_v40 = vpop.f32.mrb[23].mxu1  ;;  %v2216_v42 = vrot.slane %v2194_v26, %v3455_v49 }
 0x216   : > { %v1997_v43 = vpop.f32.mrb[3].mxu0 }
 0x217   : > { %v2202_v41 = vcombine.low %v2693_v34, %v2695_v37 }
 0x219   : > { %v2209_v44 = vrot.slane %v2202_v41, %v3455_v49 }
 0x21b   : > { %v2217_v45 = vcombine.low %v2209_v44, %v2216_v42 }
 0x21d   : > { %v2224_v46 = vrot.slane %v2217_v45, %v3455_v49 }
 0x21f   : > { %2230 = vst.msk [vmem:[%s258_s27] sm:$0x7] %vm2228_vm1, %v2224_v46 }
 0x220 PF: > { %s19_s19 = sadd.s32 1, %s3217_s19   ;;  %s3730_s1 = sld [smem:[#allocation8_spill]] }
 0x221   : > { %p16_p5 = scmp.ge.s32.totalorder %s19_s19, 12   ;;  %s3731_s22 = sld [smem:[#allocation9_spill]] }
 0x222   : > { %s3732_s12 = smov %s3193_s13  ;;  %s3733_s13 = smov %s3197_s14 }
 0x223   : > { %s3734_s14 = smov %s3317_s4  ;;  %s3735_s15 = smov %s3209_s17 }
 0x224   : > { %s3736_s16 = smov %s3213_s18  ;;  %18 = sbr.rel (!%p16_p5) target bundleno = 9 (0x9), region = 85 }
 0x226   : > { %s3737_s17 = smov %s3730_s1 }
 0x227   : > { %s3738_s18 = smov %s3731_s22 }
 0x22b   :  { %2259 = vsyncpa [#allocation3], 1 }
 0x22c   :  { %2261 = vsyncpa [#allocation3 + $0x1], 1 }
 0x22d   :  { %2262 = vsyncpa [#allocation5], 1 }
 0x22e   :  { %2264 = vsyncpa [#allocation5 + $0x1], 1 }

</bundles_post_ra>
